<compile_context>
chip_gen: v5e
topology: v5e:2x2
jax: 0.10.0
libtpu: 0.0.40
codegen_flags: <defaults>
</compile_context>

<pallas_src>
import functools

import jax
import jax.numpy as jnp
from jax import lax
from jax.experimental import pallas as pl
from jax.experimental.pallas import tpu as pltpu

EXPANSION = 4
BN_EPS = 1e-5
LANE = 128


def _default_vmem_limit():
    # ~3/4 of physical VMEM: 48 MiB on v7x (64 MiB phys), 96 MiB on v5e/v6e (128 MiB).
    try:
        cap = pltpu.get_tpu_info().vmem_capacity_bytes
        return max(32 * 1024 * 1024, min(int(cap) * 3 // 4, 96 * 1024 * 1024))
    except Exception:
        return 48 * 1024 * 1024


VMEM_LIMIT_BYTES = _default_vmem_limit()


def _round_up(x, m):
    return ((x + m - 1) // m) * m


# ---------------------------------------------------------------------------
# Pallas kernels
# ---------------------------------------------------------------------------
def _matmul_bn_kernel(x_ref, w_ref, scale_ref, shift_ref, o_ref, *, relu):
    """y = maybe_relu((x @ w) * scale + shift) -- 1x1 conv with folded BN.
    x arrives f32; the bf16 cast runs on the VPU under the MXU, so no separate
    bf16 copy of the activation ever hits HBM."""
    x = x_ref[...].astype(jnp.bfloat16)
    y = jnp.dot(x, w_ref[...], preferred_element_type=jnp.float32)
    y = y * scale_ref[...] + shift_ref[...]
    if relu:
        y = jnp.maximum(y, 0.0)
    o_ref[...] = y.astype(o_ref.dtype)


def _matmul_bn_dual_kernel(x_ref, w_ref, s1_ref, b1_ref, ssc_ref, bsc_ref,
                           h1_ref, res_ref, *, cmid_p):
    """Fused layer1 + projection shortcut (stride==1): one x read, one wide matmul
    y = x @ [w1 | wsc]; BN+ReLU on the first cmid_p (lane-aligned) columns, BN only
    on the rest.  Residual is written in bf16."""
    x = x_ref[...].astype(jnp.bfloat16)
    y = jnp.dot(x, w_ref[...], preferred_element_type=jnp.float32)
    h1 = y[:, :cmid_p] * s1_ref[...] + b1_ref[...]
    h1_ref[...] = jnp.maximum(h1, 0.0).astype(h1_ref.dtype)
    res_ref[...] = (y[:, cmid_p:] * ssc_ref[...] + bsc_ref[...]).astype(res_ref.dtype)


def _block_tail_kernel(h1_ref, w2_ref, s2_ref, b2_ref, w3_ref, s3_ref, b3_ref,
                       res_ref, o_ref, pad_ref, slab_ref, *, stride, ho, wo):
    """Per image: 3x3 conv (+BN+ReLU), 1x1 conv (+BN), residual add, ReLU.

    The 3x3 conv is ONE MXU matmul with K = 9*cmid_p: h1 is halo-padded into a VMEM
    scratch (no HBM pad round trip), a lane-aligned im2col slab is assembled in VMEM
    (no HBM im2col), and there is no per-tap accumulator read-modify-write."""
    _, h, w, cmid_p = h1_ref.shape

    # Zero halo + interior copy, entirely in VMEM.
    pad_ref[...] = jnp.zeros_like(pad_ref)
    pad_ref[pl.ds(1, h), pl.ds(1, w), :] = h1_ref[0]

    # Build the im2col slab: column block (ky*3+kx) holds the shifted/strided tap.
    for ky in range(3):
        for kx in range(3):
            if stride == 1:
                tap = pad_ref[pl.ds(ky, ho), pl.ds(kx, wo), :]
            else:
                # TODO(synk): pre-split h1 into even/odd phases (space-to-depth) so
                # these become unit-stride loads for stride == 2.
                tap = pad_ref[pl.ds(ky, ho, stride), pl.ds(kx, wo, stride), :]
            c0 = (ky * 3 + kx) * cmid_p
            slab_ref[:, :, pl.ds(c0, cmid_p)] = tap

    # Single big-K matmul fills the MXU contraction; no accumulator RMW.
    slab = slab_ref[...].reshape(ho * wo, 9 * cmid_p)
    h2 = jnp.dot(slab, w2_ref[...], preferred_element_type=jnp.float32)
    h2 = jnp.maximum(h2 * s2_ref[...] + b2_ref[...], 0.0)
    y = jnp.dot(h2.astype(jnp.bfloat16), w3_ref[...],
                preferred_element_type=jnp.float32)
    y = y * s3_ref[...] + b3_ref[...] + res_ref[0].astype(jnp.float32)
    o_ref[0] = jnp.maximum(y, 0.0).astype(o_ref.dtype)


# ---------------------------------------------------------------------------
# pallas_call wrappers
# ---------------------------------------------------------------------------
def _pick_tm(m):
    # 512-row tiles reach ~85% of the HBM roofline; 256 only for very small inputs.
    return 512 if m >= 512 else 256


def _pad_rows(x2d, tm):
    m = x2d.shape[0]
    mp = pl.cdiv(m, tm) * tm
    if mp != m:
        x2d = jnp.pad(x2d, ((0, mp - m), (0, 0)))
    return x2d, mp


def fused_matmul_bn(x2d, w, scale, shift, *, relu, out_dtype=jnp.float32):
    m, k = x2d.shape
    n = w.shape[1]
    tm = _pick_tm(m)
    xp, mp = _pad_rows(x2d, tm)
    out = pl.pallas_call(
        functools.partial(_matmul_bn_kernel, relu=relu),
        out_shape=jax.ShapeDtypeStruct((mp, n), out_dtype),
        grid_spec=pltpu.PrefetchScalarGridSpec(
            num_scalar_prefetch=0,
            grid=(mp // tm,),
            in_specs=[
                pl.BlockSpec((tm, k), lambda i: (i, 0)),
                pl.BlockSpec((k, n), lambda i: (0, 0)),
                pl.BlockSpec((1, n), lambda i: (0, 0)),
                pl.BlockSpec((1, n), lambda i: (0, 0)),
            ],
            out_specs=pl.BlockSpec((tm, n), lambda i: (i, 0)),
        ),
        compiler_params=pltpu.CompilerParams(
            dimension_semantics=("parallel",),
            vmem_limit_bytes=VMEM_LIMIT_BYTES),
    )(xp, w, scale, shift)
    return out[:m] if mp != m else out


def fused_matmul_bn_dual(x2d, wcat, s1, b1, ssc, bsc, cmid_p):
    m, k = x2d.shape
    ntot = wcat.shape[1]
    nsc = ntot - cmid_p
    tm = _pick_tm(m)
    xp, mp = _pad_rows(x2d, tm)
    h1, res = pl.pallas_call(
        functools.partial(_matmul_bn_dual_kernel, cmid_p=cmid_p),
        out_shape=(jax.ShapeDtypeStruct((mp, cmid_p), jnp.bfloat16),
                   jax.ShapeDtypeStruct((mp, nsc), jnp.bfloat16)),
        grid_spec=pltpu.PrefetchScalarGridSpec(
            num_scalar_prefetch=0,
            grid=(mp // tm,),
            in_specs=[
                pl.BlockSpec((tm, k), lambda i: (i, 0)),
                pl.BlockSpec((k, ntot), lambda i: (0, 0)),
                pl.BlockSpec((1, cmid_p), lambda i: (0, 0)),
                pl.BlockSpec((1, cmid_p), lambda i: (0, 0)),
                pl.BlockSpec((1, nsc), lambda i: (0, 0)),
                pl.BlockSpec((1, nsc), lambda i: (0, 0)),
            ],
            out_specs=(pl.BlockSpec((tm, cmid_p), lambda i: (i, 0)),
                       pl.BlockSpec((tm, nsc), lambda i: (i, 0))),
        ),
        compiler_params=pltpu.CompilerParams(
            dimension_semantics=("parallel",),
            vmem_limit_bytes=VMEM_LIMIT_BYTES),
    )(xp, wcat, s1, b1, ssc, bsc)
    if mp != m:
        h1, res = h1[:m], res[:m]
    return h1, res


def fused_block_tail(h1, w2, s2, b2, w3, s3, b3, res, *, stride, ho, wo,
                     out_dtype=jnp.float32):
    n, h, w, cmid_p = h1.shape
    out4 = w3.shape[1]
    m_img = ho * wo
    return pl.pallas_call(
        functools.partial(_block_tail_kernel, stride=stride, ho=ho, wo=wo),
        out_shape=jax.ShapeDtypeStruct((n, m_img, out4), out_dtype),
        grid_spec=pltpu.PrefetchScalarGridSpec(
            num_scalar_prefetch=0,
            grid=(n,),
            in_specs=[
                pl.BlockSpec((1, h, w, cmid_p), lambda i: (i, 0, 0, 0)),
                pl.BlockSpec((9 * cmid_p, cmid_p), lambda i: (0, 0)),
                pl.BlockSpec((1, cmid_p), lambda i: (0, 0)),
                pl.BlockSpec((1, cmid_p), lambda i: (0, 0)),
                pl.BlockSpec((cmid_p, out4), lambda i: (0, 0)),
                pl.BlockSpec((1, out4), lambda i: (0, 0)),
                pl.BlockSpec((1, out4), lambda i: (0, 0)),
                pl.BlockSpec((1, m_img, out4), lambda i: (i, 0, 0)),
            ],
            out_specs=pl.BlockSpec((1, m_img, out4), lambda i: (i, 0, 0)),
            scratch_shapes=[
                pltpu.VMEM((h + 2, w + 2, cmid_p), jnp.bfloat16),  # halo-padded h1
                pltpu.VMEM((ho, wo, 9 * cmid_p), jnp.bfloat16),    # im2col slab
            ],
        ),
        compiler_params=pltpu.CompilerParams(
            dimension_semantics=("parallel",),
            vmem_limit_bytes=VMEM_LIMIT_BYTES),
    )(h1, w2, s2, b2, w3, s3, b3, res)


# ---------------------------------------------------------------------------
# Parameters: torch-style init + one-time kernel-ready preprocessing
# ---------------------------------------------------------------------------
def init_params(key, in_dim, out_dim, stride):
    out4 = out_dim * EXPANSION
    keys = jax.random.split(key, 8)

    def conv_w(k, cout, cin, kh, kw):
        fan_in = cin * kh * kw
        return jax.random.normal(k, (cout, cin, kh, kw), jnp.float32) / jnp.sqrt(fan_in)

    def bn_p(k, c):
        k1, k2, k3, k4 = jax.random.split(k, 4)
        gamma = 1.0 + 0.1 * jax.random.normal(k1, (c,), jnp.float32)
        beta = 0.1 * jax.random.normal(k2, (c,), jnp.float32)
        mean = 0.1 * jax.random.normal(k3, (c,), jnp.float32)
        var = jax.random.uniform(k4, (c,), jnp.float32, minval=0.5, maxval=1.5)
        return gamma, beta, mean, var

    p = {
        "stride": stride,
        "w1": conv_w(keys[0], out_dim, in_dim, 1, 1),       # torch (Cout,Cin,1,1)
        "bn1": bn_p(keys[1], out_dim),
        "w2": conv_w(keys[2], out_dim, out_dim, 3, 3),      # torch (Cout,Cin,3,3)
        "bn2": bn_p(keys[3], out_dim),
        "w3": conv_w(keys[4], out4, out_dim, 1, 1),
        "bn3": bn_p(keys[5], out4),
        "has_shortcut_conv": (stride != 1) or (in_dim != out4),
    }
    if p["has_shortcut_conv"]:
        p["wsc"] = conv_w(keys[6], out4, in_dim, 1, 1)
        p["bnsc"] = bn_p(keys[7], out4)
    return p


def prepare_params(raw):
    """One-time, zero runtime cost: fold BN into per-channel scale/shift, transpose
    weights to (Cin, Cout) matmul layout, cast to bf16, and zero-pad the bottleneck
    width cmid up to a multiple of 128 lanes so intermediate stores are lane-dense
    and the dual-kernel output split lands on a lane boundary."""
    def fold(bn, pad_to=None):
        gamma, beta, mean, var = bn
        scale = gamma / jnp.sqrt(var + BN_EPS)
        shift = beta - mean * scale
        if pad_to is not None and pad_to > scale.shape[0]:
            pad = pad_to - scale.shape[0]
            scale = jnp.pad(scale, (0, pad))
            shift = jnp.pad(shift, (0, pad))
        return scale[None, :].astype(jnp.float32), shift[None, :].astype(jnp.float32)

    cmid = raw["w1"].shape[0]
    cmid_p = _round_up(cmid, LANE)
    kp = {"stride": raw["stride"], "has_shortcut_conv": raw["has_shortcut_conv"],
          "cmid_p": cmid_p}

    # layer1 1x1: torch (Cmid,Cin,1,1) -> (Cin,Cmid), pad cols to cmid_p.
    w1t = raw["w1"][:, :, 0, 0].T
    kp["w1t"] = jnp.pad(w1t, ((0, 0), (0, cmid_p - cmid))).astype(jnp.bfloat16)
    kp["s1"], kp["b1"] = fold(raw["bn1"], cmid_p)

    # layer2 3x3: torch (Cmid,Cmid,3,3) -> (ky,kx,Cin,Cout), pad both channel dims,
    # flatten to (9*cmid_p, cmid_p) matching the im2col slab column order.
    w2 = jnp.transpose(raw["w2"], (2, 3, 1, 0))
    w2 = jnp.pad(w2, ((0, 0), (0, 0), (0, cmid_p - cmid), (0, cmid_p - cmid)))
    kp["w2t"] = w2.reshape(9 * cmid_p, cmid_p).astype(jnp.bfloat16)
    kp["s2"], kp["b2"] = fold(raw["bn2"], cmid_p)

    # layer3 1x1: torch (Out4,Cmid,1,1) -> (Cmid,Out4), pad rows to cmid_p.
    w3t = raw["w3"][:, :, 0, 0].T
    kp["w3t"] = jnp.pad(w3t, ((0, cmid_p - cmid), (0, 0))).astype(jnp.bfloat16)
    kp["s3"], kp["b3"] = fold(raw["bn3"])

    if raw["has_shortcut_conv"]:
        kp["wsct"] = raw["wsc"][:, :, 0, 0].T.astype(jnp.bfloat16)        # (Cin,Out4)
        kp["ssc"], kp["bsc"] = fold(raw["bnsc"])
        if raw["stride"] == 1:
            kp["wcat"] = jnp.concatenate([kp["w1t"], kp["wsct"]], axis=1)
    return kp


# ---------------------------------------------------------------------------
# ConvBlock forward (Pallas version)
# ---------------------------------------------------------------------------
def conv_block_forward(x_nchw, kp):
    stride = kp["stride"]
    x = jnp.transpose(x_nchw, (0, 2, 3, 1)).astype(jnp.float32)   # NCHW -> NHWC
    n, h, w, cin = x.shape
    cmid_p = kp["cmid_p"]
    out4 = kp["w3t"].shape[1]
    ho = (h - 1) // stride + 1
    wo = (w - 1) // stride + 1

    x2d = x.reshape(n * h * w, cin)        # f32; bf16 cast happens inside the kernels

    # --- layer1 (1x1 conv+BN+ReLU), fused with the shortcut conv when stride==1 ---
    if kp["has_shortcut_conv"] and stride == 1:
        h1_2d, res2d = fused_matmul_bn_dual(
            x2d, kp["wcat"], kp["s1"], kp["b1"], kp["ssc"], kp["bsc"], cmid_p)
    else:
        h1_2d = fused_matmul_bn(x2d, kp["w1t"], kp["s1"], kp["b1"],
                                relu=True, out_dtype=jnp.bfloat16)
        if kp["has_shortcut_conv"]:
            xs = x[:, ::stride, ::stride, :].reshape(n * ho * wo, cin)
            res2d = fused_matmul_bn(xs, kp["wsct"], kp["ssc"], kp["bsc"],
                                    relu=False, out_dtype=jnp.bfloat16)
        else:
            res2d = x2d                  # identity shortcut (stride==1, cin==out4)

    # --- layer2 (3x3) + layer3 (1x1) + residual + ReLU: single fused kernel -------
    h1 = h1_2d.reshape(n, h, w, cmid_p)           # free reshape; halo pad is in VMEM
    res = res2d.reshape(n, ho * wo, out4)
    out = fused_block_tail(h1, kp["w2t"], kp["s2"], kp["b2"],
                           kp["w3t"], kp["s3"], kp["b3"], res,
                           stride=stride, ho=ho, wo=wo)
    out = out.reshape(n, ho, wo, out4)
    return jnp.transpose(out, (0, 3, 1, 2))                       # NHWC -> NCHW


# ---------------------------------------------------------------------------
# Pure-JAX f32 reference (correctness check only)
# ---------------------------------------------------------------------------
def ref_forward(x_nchw, params, stride):
    x = jnp.transpose(x_nchw, (0, 2, 3, 1)).astype(jnp.float32)

    def conv(xi, w_t, s, pad):
        w = jnp.transpose(w_t, (2, 3, 1, 0))                      # OIHW -> HWIO
        return lax.conv_general_dilated(
            xi, w, (s, s), [(pad, pad), (pad, pad)],
            dimension_numbers=("NHWC", "HWIO", "NHWC"))

    def bn(xi, bnp):
        gamma, beta, mean, var = bnp
        return (xi - mean) * (gamma / jnp.sqrt(var + BN_EPS)) + beta

    h = jax.nn.relu(bn(conv(x, params["w1"], 1, 0), params["bn1"]))
    h = jax.nn.relu(bn(conv(h, params["w2"], stride, 1), params["bn2"]))
    h = bn(conv(h, params["w3"], 1, 0), params["bn3"])
    if params["has_shortcut_conv"]:
        sc = bn(conv(x, params["wsc"], stride, 0), params["bnsc"])
    else:
        sc = x
    out = jax.nn.relu(h + sc)
    return jnp.transpose(out, (0, 3, 1, 2))


if __name__ == "__main__":
    key = jax.random.PRNGKey(0)

    configs = [
        dict(in_dim=4, out_dim=8, stride=1, hw=16),   # projection shortcut -> dual kernel
        dict(in_dim=32, out_dim=8, stride=1, hw=16),  # identity shortcut
        dict(in_dim=16, out_dim=8, stride=1, hw=12),  # projection shortcut + row padding
    ]
    for idx, cfg in enumerate(configs):
        kx_key, kparam = jax.random.split(jax.random.fold_in(key, idx))
        hw = cfg["hw"]
        x = jax.random.normal(kx_key, (2, cfg["in_dim"], hw, hw), jnp.float32)  # NCHW
        raw = init_params(kparam, cfg["in_dim"], cfg["out_dim"], cfg["stride"])
        kp = prepare_params(raw)

        out = jax.block_until_ready(conv_block_forward(x, kp))
        ref = jax.block_until_ready(ref_forward(x, raw, cfg["stride"]))

        ho = (hw - 1) // cfg["stride"] + 1
        assert out.shape == (2, cfg["out_dim"] * EXPANSION, ho, ho), out.shape
        max_err = float(jnp.max(jnp.abs(out - ref)))
        # bf16 matmuls / residual with f32 accumulation vs f32 reference.
        assert jnp.allclose(out, ref, atol=5e-2, rtol=5e-2), (cfg, max_err)

    print("KERNEL_OK")
</pallas_src>

<mosaic_0001>
module attributes {stable_mosaic.version = 11 : i64} {
  func.func @_matmul_bn_dual_kernel(%arg0: i32, %arg1: memref<512x4xf32, #tpu.memory_space<vmem>>, %arg2: memref<4x160xbf16, #tpu.memory_space<vmem>>, %arg3: memref<1x128xf32, #tpu.memory_space<vmem>>, %arg4: memref<1x128xf32, #tpu.memory_space<vmem>>, %arg5: memref<1x32xf32, #tpu.memory_space<vmem>>, %arg6: memref<1x32xf32, #tpu.memory_space<vmem>>, %arg7: memref<512x128xbf16, #tpu.memory_space<vmem>>, %arg8: memref<512x32xbf16, #tpu.memory_space<vmem>>) attributes {dimension_semantics = [#tpu.dimension_semantics<parallel>], iteration_bounds = array<i64: 1>, scalar_prefetch = 0 : i64, scratch_operands = 0 : i64, tpu.core_type = #tpu.core_type<tc>, window_params = [{transform_indices = @transform_0, window_bounds = array<i64: 512, 4>}, {pipeline_mode = #tpu.pipeline_mode<synchronous>, transform_indices = @transform_1, window_bounds = array<i64: 4, 160>}, {pipeline_mode = #tpu.pipeline_mode<synchronous>, transform_indices = @transform_2, window_bounds = array<i64: 1, 128>}, {pipeline_mode = #tpu.pipeline_mode<synchronous>, transform_indices = @transform_3, window_bounds = array<i64: 1, 128>}, {pipeline_mode = #tpu.pipeline_mode<synchronous>, transform_indices = @transform_4, window_bounds = array<i64: 1, 32>}, {pipeline_mode = #tpu.pipeline_mode<synchronous>, transform_indices = @transform_5, window_bounds = array<i64: 1, 32>}, {transform_indices = @transform_6, window_bounds = array<i64: 512, 128>}, {transform_indices = @transform_7, window_bounds = array<i64: 512, 32>}]} {
    %c0 = arith.constant 0 : index
    %c0_0 = arith.constant 0 : index
    %0 = vector.load %arg1[%c0, %c0_0] : memref<512x4xf32, #tpu.memory_space<vmem>>, vector<512x4xf32>
    %1 = arith.truncf %0 : vector<512x4xf32> to vector<512x4xbf16>
    %c0_1 = arith.constant 0 : index
    %c0_2 = arith.constant 0 : index
    %2 = vector.load %arg2[%c0_1, %c0_2] : memref<4x160xbf16, #tpu.memory_space<vmem>>, vector<4x160xbf16>
    %cst = arith.constant dense<0.000000e+00> : vector<512x160xf32>
    %3 = tpu.matmul %1, %2, %cst {dimension_numbers = #tpu.dot_dimension_numbers<[1], [0], [0], [1], [0, 0, 1, 1], [], []>} : vector<512x4xbf16>, vector<4x160xbf16>, vector<512x160xf32> -> vector<512x160xf32>
    %4 = vector.extract_strided_slice %3 {offsets = [0, 0], sizes = [512, 128], strides = [1, 1]} : vector<512x160xf32> to vector<512x128xf32>
    %c0_3 = arith.constant 0 : index
    %c0_4 = arith.constant 0 : index
    %5 = vector.load %arg3[%c0_3, %c0_4] : memref<1x128xf32, #tpu.memory_space<vmem>>, vector<1x128xf32>
    %6 = vector.broadcast %5 : vector<1x128xf32> to vector<512x128xf32>
    %7 = arith.mulf %4, %6 : vector<512x128xf32>
    %c0_5 = arith.constant 0 : index
    %c0_6 = arith.constant 0 : index
    %8 = vector.load %arg4[%c0_5, %c0_6] : memref<1x128xf32, #tpu.memory_space<vmem>>, vector<1x128xf32>
    %9 = vector.broadcast %8 : vector<1x128xf32> to vector<512x128xf32>
    %10 = arith.addf %7, %9 : vector<512x128xf32>
    %cst_7 = arith.constant 0.000000e+00 : f32
    %11 = vector.broadcast %cst_7 : f32 to vector<512x128xf32>
    %12 = arith.maximumf %10, %11 : vector<512x128xf32>
    %13 = arith.truncf %12 : vector<512x128xf32> to vector<512x128xbf16>
    %c0_8 = arith.constant 0 : index
    %c0_9 = arith.constant 0 : index
    %14 = vector.load %arg7[%c0_8, %c0_9] : memref<512x128xbf16, #tpu.memory_space<vmem>>, vector<512x128xbf16>
    tpu.vector_store %arg7[%c0_8, %c0_9], %13 {strides = array<i32>} : memref<512x128xbf16, #tpu.memory_space<vmem>>, vector<512x128xbf16>,
    %15 = vector.extract_strided_slice %3 {offsets = [0, 128], sizes = [512, 32], strides = [1, 1]} : vector<512x160xf32> to vector<512x32xf32>
    %c0_10 = arith.constant 0 : index
    %c0_11 = arith.constant 0 : index
    %16 = vector.load %arg5[%c0_10, %c0_11] : memref<1x32xf32, #tpu.memory_space<vmem>>, vector<1x32xf32>
    %17 = vector.broadcast %16 : vector<1x32xf32> to vector<512x32xf32>
    %18 = arith.mulf %15, %17 : vector<512x32xf32>
    %c0_12 = arith.constant 0 : index
    %c0_13 = arith.constant 0 : index
    %19 = vector.load %arg6[%c0_12, %c0_13] : memref<1x32xf32, #tpu.memory_space<vmem>>, vector<1x32xf32>
    %20 = vector.broadcast %19 : vector<1x32xf32> to vector<512x32xf32>
    %21 = arith.addf %18, %20 : vector<512x32xf32>
    %22 = arith.truncf %21 : vector<512x32xf32> to vector<512x32xbf16>
    %c0_14 = arith.constant 0 : index
    %c0_15 = arith.constant 0 : index
    %23 = vector.load %arg8[%c0_14, %c0_15] : memref<512x32xbf16, #tpu.memory_space<vmem>>, vector<512x32xbf16>
    tpu.vector_store %arg8[%c0_14, %c0_15], %22 {strides = array<i32>} : memref<512x32xbf16, #tpu.memory_space<vmem>>, vector<512x32xbf16>,
    return
  }
  func.func @transform_0(%arg0: i32) -> (i32, i32) {
    %c0_i32 = arith.constant 0 : i32
    %c0_i32_0 = arith.constant 0 : i32
    return %arg0, %c0_i32 : i32, i32
  }
  func.func @transform_1(%arg0: i32) -> (i32, i32) {
    %c0_i32 = arith.constant 0 : i32
    %c0_i32_0 = arith.constant 0 : i32
    %c0_i32_1 = arith.constant 0 : i32
    return %c0_i32, %c0_i32_0 : i32, i32
  }
  func.func @transform_2(%arg0: i32) -> (i32, i32) {
    %c0_i32 = arith.constant 0 : i32
    %c0_i32_0 = arith.constant 0 : i32
    %c0_i32_1 = arith.constant 0 : i32
    return %c0_i32, %c0_i32_0 : i32, i32
  }
  func.func @transform_3(%arg0: i32) -> (i32, i32) {
    %c0_i32 = arith.constant 0 : i32
    %c0_i32_0 = arith.constant 0 : i32
    %c0_i32_1 = arith.constant 0 : i32
    return %c0_i32, %c0_i32_0 : i32, i32
  }
  func.func @transform_4(%arg0: i32) -> (i32, i32) {
    %c0_i32 = arith.constant 0 : i32
    %c0_i32_0 = arith.constant 0 : i32
    %c0_i32_1 = arith.constant 0 : i32
    return %c0_i32, %c0_i32_0 : i32, i32
  }
  func.func @transform_5(%arg0: i32) -> (i32, i32) {
    %c0_i32 = arith.constant 0 : i32
    %c0_i32_0 = arith.constant 0 : i32
    %c0_i32_1 = arith.constant 0 : i32
    return %c0_i32, %c0_i32_0 : i32, i32
  }
  func.func @transform_6(%arg0: i32) -> (i32, i32) {
    %c0_i32 = arith.constant 0 : i32
    %c0_i32_0 = arith.constant 0 : i32
    return %arg0, %c0_i32 : i32, i32
  }
  func.func @transform_7(%arg0: i32) -> (i32, i32) {
    %c0_i32 = arith.constant 0 : i32
    %c0_i32_0 = arith.constant 0 : i32
    return %arg0, %c0_i32 : i32, i32
  }
}

</mosaic_0001>

<bundles_post_ra>
// kernel: tpu_custom_call.1
= control target key start
LH: loop header
LB: loop body
LE: loop exit
PB: predicated region body
PF: predicated region fallthrough
CT: control target
= control target key end

     0   :  { %s2334_s0 = inlined_call_operand.vmem [shape: f32[512,4], index: 0, kind: input, shape index: {}]   ;;  %s2335_s1 = inlined_call_operand.vmem [shape: bf16[4,160], index: 1, kind: input, shape index: {}]   ;;  %s2336_s2 = inlined_call_operand.vmem [shape: f32[1,128], index: 2, kind: input, shape index: {}]   ;;  %s2337_s3 = inlined_call_operand.vmem [shape: f32[1,128], index: 3, kind: input, shape index: {}]   ;;  %s2338_s4 = inlined_call_operand.vmem [shape: f32[1,32], index: 4, kind: input, shape index: {}]   ;;  %s2339_s5 = inlined_call_operand.vmem [shape: f32[1,32], index: 5, kind: input, shape index: {}]   ;;  %s2340_s6 = inlined_call_operand.hbm [shape: bf16[512,128], index: 6, kind: output, shape index: {0}]   ;;  %s2341_s7 = inlined_call_operand.vmem [shape: bf16[512,32], index: 7, kind: output, shape index: {1}]  }
   0x1   :  { %v123_v0 = vld [vmem:[%s2335_s1] sm:$0xf] }
   0x2   :  { %125 = vst [vmem:[#allocation1] ss:$4 sm:$0xff] %v123_v0  ;;  %v27_v1 = vld [vmem:[%s2334_s0] sm:$0xff] }
   0x3   :  { %13 = vsyncpa [#allocation3], 0  ;;  %vm225_vm0 = vcmask 1041408   ;;  %v28_v2 = vld [vmem:[%s2334_s0 + $0x8] sm:$0xff]  ;;  %v59_v3 = vld [vmem:[%s2334_s0 + $0x100] sm:$0xff]  ;;  %vm128_vm1 = vcmask 31744  }
   0x4   :  { %v60_v4 = vld [vmem:[%s2334_s0 + $0x108] sm:$0xff]  ;;  %v91_v9 = vpack.c.bf16 %v28_v2, %v27_v1  ;;  %v29_v11 = vld [vmem:[%s2334_s0 + $0x10] sm:$0xff]  ;;  %v30_v12 = vld [vmem:[%s2334_s0 + $0x18] sm:$0xff]  ;;  %vm1096_vm2 = vcmask 257024   ;;  %s1477_s21 = smov [#allocation2]   ;;  %s1167_s24 = sshll.u32 %s2340_s6, 4  ;;  %s1168_s24 = int_to_ptr.hbm [resolvable:$true] %s1167_s24 }
   0x5   :  { %v107_v10 = vpack.c.bf16 %v60_v4, %v59_v3  ;;  %v61_v13 = vld [vmem:[%s2334_s0 + $0x110] sm:$0xff]  ;;  %v62_v14 = vld [vmem:[%s2334_s0 + $0x118] sm:$0xff]  ;;  %v92_v15 = vpack.c.bf16 %v30_v12, %v29_v11  ;;  %v31_v17 = vld [vmem:[%s2334_s0 + $0x20] sm:$0xff]  ;;  %s1165_s22 = sshll.u32 %s1477_s21, 4  ;;  %s1478_s27 = smov 64   ;;  %s1166_s22 = int_to_ptr.vmem [resolvable:$true] %s1165_s22 }
   0x6   :  { %v108_v16 = vpack.c.bf16 %v62_v14, %v61_v13  ;;  %v32_v18 = vld [vmem:[%s2334_s0 + $0x28] sm:$0xff]  ;;  %v63_v19 = vld [vmem:[%s2334_s0 + $0x120] sm:$0xff]  ;;  %v33_v23 = vld [vmem:[%s2334_s0 + $0x30] sm:$0xff]  ;;  %s1479_s28 = smov 4  }
   0x7   :  { %v64_v20 = vld [vmem:[%s2334_s0 + $0x128] sm:$0xff]  ;;  %v93_v21 = vpack.c.bf16 %v32_v18, %v31_v17  ;;  %v34_v24 = vld [vmem:[%s2334_s0 + $0x38] sm:$0xff]  ;;  %v65_v25 = vld [vmem:[%s2334_s0 + $0x130] sm:$0xff] }
   0x8   :  { %v109_v22 = vpack.c.bf16 %v64_v20, %v63_v19  ;;  %v66_v26 = vld [vmem:[%s2334_s0 + $0x138] sm:$0xff]  ;;  %v94_v27 = vpack.c.bf16 %v34_v24, %v33_v23  ;;  %v35_v29 = vld [vmem:[%s2334_s0 + $0x40] sm:$0xff]  ;;  %v36_v30 = vld [vmem:[%s2334_s0 + $0x48] sm:$0xff] }
   0x9   :  { %v126_v5 = vld.sshfl [vmem:[#allocation1] sm:$0xff pattern:$0x73625140]  ;;  %v127_v6 = vld.sshfl [vmem:[#allocation1 + $0x8] sm:$0xff pattern:$0x73625140]  ;;  %v110_v28 = vpack.c.bf16 %v66_v26, %v65_v25  ;;  %v95_v33 = vpack.c.bf16 %v36_v30, %v35_v29 }
   0xa   :  { %v226_v7 = vsel %vm225_vm0, %v126_v5, 0  ;;  %v228_v8 = vsel %vm225_vm0, %v127_v6, 0  ;;  %v67_v31 = vld [vmem:[%s2334_s0 + $0x140] sm:$0xff]  ;;  %v68_v32 = vld [vmem:[%s2334_s0 + $0x148] sm:$0xff]  ;;  %v37_v35 = vld [vmem:[%s2334_s0 + $0x50] sm:$0xff] }
   0xb   :  { %237 = vmatpush.bf16.msra.mxu0 %v226_v7  ;;  %1438 = vmatpush.bf16.msra.mxu2 %v226_v7  ;;  %v111_v34 = vpack.c.bf16 %v68_v32, %v67_v31  ;;  %v38_v36 = vld [vmem:[%s2334_s0 + $0x58] sm:$0xff]  ;;  %v69_v37 = vld [vmem:[%s2334_s0 + $0x150] sm:$0xff]  ;;  %v39_v41 = vld [vmem:[%s2334_s0 + $0x60] sm:$0xff] }
   0xc   :  { %1439 = vmatpush.bf16.msra.mxu3 %v228_v8  ;;  %406 = vmatpush.bf16.msra.mxu1 %v228_v8  ;;  %v70_v38 = vld [vmem:[%s2334_s0 + $0x158] sm:$0xff]  ;;  %v96_v39 = vpack.c.bf16 %v38_v36, %v37_v35  ;;  %v40_v42 = vld [vmem:[%s2334_s0 + $0x68] sm:$0xff]  ;;  %v71_v43 = vld [vmem:[%s2334_s0 + $0x160] sm:$0xff] }
   0xd   :  { %v112_v40 = vpack.c.bf16 %v70_v38, %v69_v37  ;;  %v72_v44 = vld [vmem:[%s2334_s0 + $0x168] sm:$0xff]  ;;  %v97_v45 = vpack.c.bf16 %v40_v42, %v39_v41  ;;  %v41_v47 = vld [vmem:[%s2334_s0 + $0x70] sm:$0xff]  ;;  %v42_v48 = vld [vmem:[%s2334_s0 + $0x78] sm:$0xff] }
   0xe   :  { %1183 = vmatmul.msk.bf16.vlgmr.msra.gmra.mxu0 %vm128_vm1, %v91_v9  ;;  %1199 = vmatmul.msk.bf16.vlgmr.msra.gmra.mxu2 %vm128_vm1, %v107_v10  ;;  %v113_v46 = vpack.c.bf16 %v72_v44, %v71_v43  ;;  %v73_v49 = vld [vmem:[%s2334_s0 + $0x170] sm:$0xff]  ;;  %v74_v50 = vld [vmem:[%s2334_s0 + $0x178] sm:$0xff]  ;;  %v98_v51 = vpack.c.bf16 %v42_v48, %v41_v47  ;;  %v43_v53 = vld [vmem:[%s2334_s0 + $0x80] sm:$0xff] }
   0xf   :  { %1231 = vmatmul.msk.bf16.vlgmr.msra.gmra.mxu3 %vm128_vm1, %v107_v10  ;;  %1215 = vmatmul.msk.bf16.vlgmr.msra.gmra.mxu1 %vm128_vm1, %v91_v9  ;;  %v114_v52 = vpack.c.bf16 %v74_v50, %v73_v49  ;;  %v44_v54 = vld [vmem:[%s2334_s0 + $0x88] sm:$0xff]  ;;  %v75_v55 = vld [vmem:[%s2334_s0 + $0x180] sm:$0xff]  ;;  %v46_v17 = vld [vmem:[%s2334_s0 + $0x98] sm:$0xff] }
  0x10   :  { %v76_v56 = vld [vmem:[%s2334_s0 + $0x188] sm:$0xff]  ;;  %v1666_v57 = vld [vmem:[%s2338_s4] ss:$0 sm:$0xff]  ;;  %v99_v58 = vpack.c.bf16 %v44_v54, %v43_v53  ;;  %v77_v20 = vld [vmem:[%s2334_s0 + $0x190] sm:$0xff] }
  0x11   :  { %v115_v59 = vpack.c.bf16 %v76_v56, %v75_v55  ;;  %v1671_v61 = vld [vmem:[%s2339_s5] ss:$0 sm:$0xff] }
  0x12   :  { %v1676_v62 = vld [vmem:[%s2336_s2] ss:$0 sm:$0xff] }
  0x13   :  { %v1688_v3 = vld [vmem:[%s2337_s3] ss:$0 sm:$0xff] }
  0x14   :  { %v47_v56 = vld [vmem:[%s2334_s0 + $0xa0] sm:$0xff] }
  0x1e   :  { %1184 = vmatmul.msk.bf16.gmra.mxu0 %vm128_vm1, %v92_v15  ;;  %1200 = vmatmul.msk.bf16.gmra.mxu2 %vm128_vm1, %v108_v16 }
  0x1f   :  { %1232 = vmatmul.msk.bf16.gmra.mxu3 %vm128_vm1, %v108_v16  ;;  %1216 = vmatmul.msk.bf16.gmra.mxu1 %vm128_vm1, %v92_v15  ;;  %v45_v16 = vld [vmem:[%s2334_s0 + $0x90] sm:$0xff] }
  0x20   :  { %v100_v26 = vpack.c.bf16 %v46_v17, %v45_v16 }
  0x2e   :  { %1185 = vmatmul.msk.bf16.gmra.mxu0 %vm128_vm1, %v93_v21  ;;  %1201 = vmatmul.msk.bf16.gmra.mxu2 %vm128_vm1, %v109_v22 }
  0x2f   :  { %1233 = vmatmul.msk.bf16.gmra.mxu3 %vm128_vm1, %v109_v22  ;;  %1217 = vmatmul.msk.bf16.gmra.mxu1 %vm128_vm1, %v93_v21  ;;  %v78_v21 = vld [vmem:[%s2334_s0 + $0x198] sm:$0xff] }
  0x30   :  { %v116_v31 = vpack.c.bf16 %v78_v21, %v77_v20 }
  0x3e   :  { %1186 = vmatmul.msk.bf16.gmra.mxu0 %vm128_vm1, %v94_v27  ;;  %1202 = vmatmul.msk.bf16.gmra.mxu2 %vm128_vm1, %v110_v28 }
  0x3f   :  { %1234 = vmatmul.msk.bf16.gmra.mxu3 %vm128_vm1, %v110_v28  ;;  %1218 = vmatmul.msk.bf16.gmra.mxu1 %vm128_vm1, %v94_v27 }
  0x4e   :  { %1187 = vmatmul.msk.bf16.gmra.mxu0 %vm128_vm1, %v95_v33  ;;  %1203 = vmatmul.msk.bf16.gmra.mxu2 %vm128_vm1, %v111_v34 }
  0x4f   :  { %1235 = vmatmul.msk.bf16.gmra.mxu3 %vm128_vm1, %v111_v34  ;;  %1219 = vmatmul.msk.bf16.gmra.mxu1 %vm128_vm1, %v95_v33 }
  0x5e   :  { %1188 = vmatmul.msk.bf16.gmra.mxu0 %vm128_vm1, %v96_v39  ;;  %1204 = vmatmul.msk.bf16.gmra.mxu2 %vm128_vm1, %v112_v40 }
  0x5f   :  { %1236 = vmatmul.msk.bf16.gmra.mxu3 %vm128_vm1, %v112_v40  ;;  %1220 = vmatmul.msk.bf16.gmra.mxu1 %vm128_vm1, %v96_v39 }
  0x6e   :  { %1189 = vmatmul.msk.bf16.gmra.mxu0 %vm128_vm1, %v97_v45  ;;  %1205 = vmatmul.msk.bf16.gmra.mxu2 %vm128_vm1, %v113_v46 }
  0x6f   :  { %1237 = vmatmul.msk.bf16.gmra.mxu3 %vm128_vm1, %v113_v46  ;;  %1221 = vmatmul.msk.bf16.gmra.mxu1 %vm128_vm1, %v97_v45 }
  0x7e   :  { %1190 = vmatmul.msk.bf16.gmra.mxu0 %vm128_vm1, %v98_v51  ;;  %1206 = vmatmul.msk.bf16.gmra.mxu2 %vm128_vm1, %v114_v52 }
  0x7f   :  { %1238 = vmatmul.msk.bf16.gmra.mxu3 %vm128_vm1, %v114_v52  ;;  %1222 = vmatmul.msk.bf16.gmra.mxu1 %vm128_vm1, %v98_v51 }
  0x8b   :  { %v239_v60 = vpop.f32.mrf.mxu0 }
  0x8c   :  { %v408_v63 = vpop.f32.mrf.mxu1  ;;  %v572_v2 = vmul.f32 %v1676_v62, %v239_v60 }
  0x8d   :  { %v900_v0 = vmul.f32 %v1666_v57, %v408_v63  ;;  %v79_v63 = vld [vmem:[%s2334_s0 + $0x1a0] sm:$0xff] }
  0x8e   :  { %1191 = vmatmul.msk.bf16.gmra.mxu0 %vm128_vm1, %v99_v58  ;;  %1207 = vmatmul.msk.bf16.gmra.mxu2 %vm128_vm1, %v115_v59  ;;  %v640_v9 = vadd.f32 %v1688_v3, %v572_v2 }
  0x8f   :  { %v968_v1 = vadd.f32 %v1671_v61, %v900_v0  ;;  %1239 = vmatmul.msk.bf16.gmra.mxu3 %vm128_vm1, %v115_v59  ;;  %1223 = vmatmul.msk.bf16.gmra.mxu1 %vm128_vm1, %v99_v58  ;;  %v48_v58 = vld [vmem:[%s2334_s0 + $0xa8] sm:$0xff] }
  0x90   :  { %v704_v22 = vmax.f32 %v640_v9, 0.0  ;;  %v80_v0 = vld [vmem:[%s2334_s0 + $0x1a8] sm:$0xff] }
  0x91   :  { %v1032_v4 = vpack.c.bf16 %v968_v1, %v968_v1  ;;  %v319_v5 = vpop.f32.mrf.mxu2 }
  0x92   :  { %v488_v6 = vpop.f32.mrf.mxu3  ;;  %v604_v14 = vmul.f32 %v1676_v62, %v319_v5 }
  0x93   :  { %1097 = vst.msk [vmem:[%s2341_s7] sm:$0xf] %vm1096_vm2, %v1032_v4  ;;  %v932_v7 = vmul.f32 %v1666_v57, %v488_v6  ;;  %v241_v8 = vpop.f32.mrf.mxu0  ;;  %v101_v6 = vpack.c.bf16 %v48_v58, %v47_v56 }
  0x94   :  { %v573_v10 = vmul.f32 %v1676_v62, %v241_v8  ;;  %v410_v11 = vpop.f32.mrf.mxu1  ;;  %v672_v27 = vadd.f32 %v1688_v3, %v604_v14 }
  0x95   :  { %v1000_v12 = vadd.f32 %v1671_v61, %v932_v7  ;;  %v901_v13 = vmul.f32 %v1666_v57, %v410_v11  ;;  %v117_v11 = vpack.c.bf16 %v80_v0, %v79_v63 }
  0x96   :  { %v641_v15 = vadd.f32 %v1688_v3, %v573_v10  ;;  %v736_v38 = vmax.f32 %v672_v27, 0.0 }
  0x97   :  { %v1064_v18 = vpack.c.bf16 %v1000_v12, %v1000_v12  ;;  %v969_v19 = vadd.f32 %v1671_v61, %v901_v13 }
  0x98   :  { %v705_v23 = vmax.f32 %v641_v15, 0.0 }
  0x99   :  { %1129 = vst.msk [vmem:[%s2341_s7 + $0x80] sm:$0xf] %vm1096_vm2, %v1064_v18  ;;  %v1033_v24 = vpack.c.bf16 %v969_v19, %v969_v19  ;;  %v321_v25 = vpop.f32.mrf.mxu2 }
  0x9a   :  { %v1250_v28 = vpack.c.bf16 %v705_v23, %v704_v22  ;;  %v605_v29 = vmul.f32 %v1676_v62, %v321_v25  ;;  %v490_v30 = vpop.f32.mrf.mxu3 }
  0x9b   :  { %1098 = vst.msk [vmem:[%s2341_s7 + $0x4] sm:$0xf] %vm1096_vm2, %v1033_v24  ;;  %v933_v32 = vmul.f32 %v1666_v57, %v490_v30  ;;  %v244_v33 = vpop.f32.mrf.mxu0 }
  0x9c   :  { %1251 = vst [vmem:[#allocation2] sm:$0xff] %v1250_v28   ;;  %v673_v34 = vadd.f32 %v1688_v3, %v605_v29  ;;  %v413_v35 = vpop.f32.mrf.mxu1  ;;  %v574_v43 = vmul.f32 %v1676_v62, %v244_v33 }
  0x9d   :  { %v1001_v36 = vadd.f32 %v1671_v61, %v933_v32  ;;  %v902_v37 = vmul.f32 %v1666_v57, %v413_v35 }
  0x9e   :  { %v737_v39 = vmax.f32 %v673_v34, 0.0  ;;  %1192 = vmatmul.msk.bf16.gmra.mxu0 %vm128_vm1, %v100_v26  ;;  %1208 = vmatmul.msk.bf16.gmra.mxu2 %vm128_vm1, %v116_v31  ;;  %v642_v49 = vadd.f32 %v1688_v3, %v574_v43 }
  0x9f   :  { %v1065_v40 = vpack.c.bf16 %v1001_v36, %v1001_v36  ;;  %v970_v41 = vadd.f32 %v1671_v61, %v902_v37  ;;  %1240 = vmatmul.msk.bf16.gmra.mxu3 %vm128_vm1, %v116_v31  ;;  %1224 = vmatmul.msk.bf16.gmra.mxu1 %vm128_vm1, %v100_v26  ;;  %v49_v36 = vld [vmem:[%s2334_s0 + $0xb0] sm:$0xff]  ;;  %v50_v37 = vld [vmem:[%s2334_s0 + $0xb8] sm:$0xff] }
  0xa0   :  { %v1330_v42 = vpack.c.bf16 %v737_v39, %v736_v38  ;;  %v706_v1 = vmax.f32 %v642_v49, 0.0 }
  0xa1   :  { %1130 = vst.msk [vmem:[%s2341_s7 + $0x84] sm:$0xf] %vm1096_vm2, %v1065_v40  ;;  %v1034_v44 = vpack.c.bf16 %v970_v41, %v970_v41  ;;  %v324_v45 = vpop.f32.mrf.mxu2  ;;  %v81_v40 = vld [vmem:[%s2334_s0 + $0x1b0] sm:$0xff]  ;;  %v82_v41 = vld [vmem:[%s2334_s0 + $0x1b8] sm:$0xff] }
  0xa2   :  { %1422 = vst [vmem:[#allocation2 + $0x80] sm:$0xff] %v1330_v42   ;;  %v493_v46 = vpop.f32.mrf.mxu3  ;;  %v606_v54 = vmul.f32 %v1676_v62, %v324_v45 }
  0xa3   :  { %1099 = vst.msk [vmem:[%s2341_s7 + $0x8] sm:$0xf] %vm1096_vm2, %v1034_v44  ;;  %v934_v47 = vmul.f32 %v1666_v57, %v493_v46  ;;  %v246_v48 = vpop.f32.mrf.mxu0  ;;  %v102_v46 = vpack.c.bf16 %v50_v37, %v49_v36 }
  0xa4   :  { %v575_v50 = vmul.f32 %v1676_v62, %v246_v48  ;;  %v415_v51 = vpop.f32.mrf.mxu1  ;;  %v674_v7 = vadd.f32 %v1688_v3, %v606_v54 }
  0xa5   :  { %v1002_v52 = vadd.f32 %v1671_v61, %v934_v47  ;;  %v903_v53 = vmul.f32 %v1666_v57, %v415_v51  ;;  %v118_v51 = vpack.c.bf16 %v82_v41, %v81_v40 }
  0xa6   :  { %v643_v55 = vadd.f32 %v1688_v3, %v575_v50  ;;  %v738_v18 = vmax.f32 %v674_v7, 0.0 }
  0xa7   :  { %v1066_v59 = vpack.c.bf16 %v1002_v52, %v1002_v52  ;;  %v971_v60 = vadd.f32 %v1671_v61, %v903_v53 }
  0xa8   :  { %v707_v2 = vmax.f32 %v643_v55, 0.0 }
  0xa9   :  { %1131 = vst.msk [vmem:[%s2341_s7 + $0x88] sm:$0xf] %vm1096_vm2, %v1066_v59  ;;  %v1035_v4 = vpack.c.bf16 %v971_v60, %v971_v60  ;;  %v326_v5 = vpop.f32.mrf.mxu2 }
  0xaa   :  { %v1255_v8 = vpack.c.bf16 %v707_v2, %v706_v1  ;;  %v607_v9 = vmul.f32 %v1676_v62, %v326_v5  ;;  %v495_v10 = vpop.f32.mrf.mxu3 }
  0xab   :  { %1100 = vst.msk [vmem:[%s2341_s7 + $0xc] sm:$0xf] %vm1096_vm2, %v1035_v4  ;;  %v935_v12 = vmul.f32 %v1666_v57, %v495_v10  ;;  %v249_v13 = vpop.f32.mrf.mxu0 }
  0xac   :  { %1407 = vst [vmem:[#allocation2 + $0x8] sm:$0xff] %v1255_v8   ;;  %v675_v14 = vadd.f32 %v1688_v3, %v607_v9  ;;  %v418_v15 = vpop.f32.mrf.mxu1  ;;  %v576_v23 = vmul.f32 %v1676_v62, %v249_v13 }
  0xad   :  { %v1003_v16 = vadd.f32 %v1671_v61, %v935_v12  ;;  %v904_v17 = vmul.f32 %v1666_v57, %v418_v15 }
  0xae   :  { %v739_v19 = vmax.f32 %v675_v14, 0.0  ;;  %1193 = vmatmul.msk.bf16.gmra.mxu0 %vm128_vm1, %v101_v6  ;;  %1209 = vmatmul.msk.bf16.gmra.mxu2 %vm128_vm1, %v117_v11  ;;  %v644_v29 = vadd.f32 %v1688_v3, %v576_v23 }
  0xaf   :  { %v1067_v20 = vpack.c.bf16 %v1003_v16, %v1003_v16  ;;  %v972_v21 = vadd.f32 %v1671_v61, %v904_v17  ;;  %1241 = vmatmul.msk.bf16.gmra.mxu3 %vm128_vm1, %v117_v11  ;;  %1225 = vmatmul.msk.bf16.gmra.mxu1 %vm128_vm1, %v101_v6  ;;  %v51_v16 = vld [vmem:[%s2334_s0 + $0xc0] sm:$0xff]  ;;  %v52_v17 = vld [vmem:[%s2334_s0 + $0xc8] sm:$0xff] }
  0xb0   :  { %v1335_v22 = vpack.c.bf16 %v739_v19, %v738_v18  ;;  %v708_v42 = vmax.f32 %v644_v29, 0.0 }
  0xb1   :  { %1132 = vst.msk [vmem:[%s2341_s7 + $0x8c] sm:$0xf] %vm1096_vm2, %v1067_v20  ;;  %v1036_v24 = vpack.c.bf16 %v972_v21, %v972_v21  ;;  %v329_v25 = vpop.f32.mrf.mxu2  ;;  %v83_v20 = vld [vmem:[%s2334_s0 + $0x1c0] sm:$0xff]  ;;  %v84_v21 = vld [vmem:[%s2334_s0 + $0x1c8] sm:$0xff] }
  0xb2   :  { %1423 = vst [vmem:[#allocation2 + $0x88] sm:$0xff] %v1335_v22   ;;  %v498_v26 = vpop.f32.mrf.mxu3  ;;  %v608_v34 = vmul.f32 %v1676_v62, %v329_v25 }
  0xb3   :  { %1101 = vst.msk [vmem:[%s2341_s7 + $0x10] sm:$0xf] %vm1096_vm2, %v1036_v24  ;;  %v936_v27 = vmul.f32 %v1666_v57, %v498_v26  ;;  %v251_v28 = vpop.f32.mrf.mxu0  ;;  %v103_v26 = vpack.c.bf16 %v52_v17, %v51_v16 }
  0xb4   :  { %v577_v30 = vmul.f32 %v1676_v62, %v251_v28  ;;  %v420_v31 = vpop.f32.mrf.mxu1  ;;  %v676_v47 = vadd.f32 %v1688_v3, %v608_v34 }
  0xb5   :  { %v1004_v32 = vadd.f32 %v1671_v61, %v936_v27  ;;  %v905_v33 = vmul.f32 %v1666_v57, %v420_v31  ;;  %v119_v31 = vpack.c.bf16 %v84_v21, %v83_v20 }
  0xb6   :  { %v645_v35 = vadd.f32 %v1688_v3, %v577_v30  ;;  %v740_v59 = vmax.f32 %v676_v47, 0.0 }
  0xb7   :  { %v1068_v38 = vpack.c.bf16 %v1004_v32, %v1004_v32  ;;  %v973_v39 = vadd.f32 %v1671_v61, %v905_v33 }
  0xb8   :  { %v709_v43 = vmax.f32 %v645_v35, 0.0 }
  0xb9   :  { %1133 = vst.msk [vmem:[%s2341_s7 + $0x90] sm:$0xf] %vm1096_vm2, %v1068_v38  ;;  %v1037_v44 = vpack.c.bf16 %v973_v39, %v973_v39  ;;  %v331_v45 = vpop.f32.mrf.mxu2 }
  0xba   :  { %v1260_v48 = vpack.c.bf16 %v709_v43, %v708_v42  ;;  %v609_v49 = vmul.f32 %v1676_v62, %v331_v45  ;;  %v500_v50 = vpop.f32.mrf.mxu3 }
  0xbb   :  { %1102 = vst.msk [vmem:[%s2341_s7 + $0x14] sm:$0xf] %vm1096_vm2, %v1037_v44  ;;  %v937_v52 = vmul.f32 %v1666_v57, %v500_v50  ;;  %v254_v53 = vpop.f32.mrf.mxu0 }
  0xbc   :  { %1408 = vst [vmem:[#allocation2 + $0x10] sm:$0xff] %v1260_v48   ;;  %v677_v54 = vadd.f32 %v1688_v3, %v609_v49  ;;  %v423_v55 = vpop.f32.mrf.mxu1  ;;  %v578_v2 = vmul.f32 %v1676_v62, %v254_v53 }
  0xbd   :  { %v1005_v56 = vadd.f32 %v1671_v61, %v937_v52  ;;  %v906_v58 = vmul.f32 %v1666_v57, %v423_v55 }
  0xbe   :  { %v741_v60 = vmax.f32 %v677_v54, 0.0  ;;  %1194 = vmatmul.msk.bf16.gmra.mxu0 %vm128_vm1, %v102_v46  ;;  %1210 = vmatmul.msk.bf16.gmra.mxu2 %vm128_vm1, %v118_v51  ;;  %v646_v9 = vadd.f32 %v1688_v3, %v578_v2 }
  0xbf   :  { %v1069_v63 = vpack.c.bf16 %v1005_v56, %v1005_v56  ;;  %v974_v0 = vadd.f32 %v1671_v61, %v906_v58  ;;  %1242 = vmatmul.msk.bf16.gmra.mxu3 %vm128_vm1, %v118_v51  ;;  %1226 = vmatmul.msk.bf16.gmra.mxu1 %vm128_vm1, %v102_v46  ;;  %v53_v56 = vld [vmem:[%s2334_s0 + $0xd0] sm:$0xff]  ;;  %v54_v58 = vld [vmem:[%s2334_s0 + $0xd8] sm:$0xff] }
  0xc0   :  { %v1340_v1 = vpack.c.bf16 %v741_v60, %v740_v59  ;;  %v710_v22 = vmax.f32 %v646_v9, 0.0 }
  0xc1   :  { %1134 = vst.msk [vmem:[%s2341_s7 + $0x94] sm:$0xf] %vm1096_vm2, %v1069_v63  ;;  %v1038_v4 = vpack.c.bf16 %v974_v0, %v974_v0  ;;  %v334_v5 = vpop.f32.mrf.mxu2  ;;  %v85_v63 = vld [vmem:[%s2334_s0 + $0x1d0] sm:$0xff]  ;;  %v86_v0 = vld [vmem:[%s2334_s0 + $0x1d8] sm:$0xff] }
  0xc2   :  { %1424 = vst [vmem:[#allocation2 + $0x90] sm:$0xff] %v1340_v1   ;;  %v503_v6 = vpop.f32.mrf.mxu3  ;;  %v610_v14 = vmul.f32 %v1676_v62, %v334_v5 }
  0xc3   :  { %1103 = vst.msk [vmem:[%s2341_s7 + $0x18] sm:$0xf] %vm1096_vm2, %v1038_v4  ;;  %v938_v7 = vmul.f32 %v1666_v57, %v503_v6  ;;  %v256_v8 = vpop.f32.mrf.mxu0  ;;  %v104_v6 = vpack.c.bf16 %v54_v58, %v53_v56 }
  0xc4   :  { %v579_v10 = vmul.f32 %v1676_v62, %v256_v8  ;;  %v425_v11 = vpop.f32.mrf.mxu1  ;;  %v678_v27 = vadd.f32 %v1688_v3, %v610_v14 }
  0xc5   :  { %v1006_v12 = vadd.f32 %v1671_v61, %v938_v7  ;;  %v907_v13 = vmul.f32 %v1666_v57, %v425_v11  ;;  %v120_v11 = vpack.c.bf16 %v86_v0, %v85_v63 }
  0xc6   :  { %v647_v15 = vadd.f32 %v1688_v3, %v579_v10  ;;  %v742_v38 = vmax.f32 %v678_v27, 0.0 }
  0xc7   :  { %v1070_v18 = vpack.c.bf16 %v1006_v12, %v1006_v12  ;;  %v975_v19 = vadd.f32 %v1671_v61, %v907_v13 }
  0xc8   :  { %v711_v23 = vmax.f32 %v647_v15, 0.0 }
  0xc9   :  { %1135 = vst.msk [vmem:[%s2341_s7 + $0x98] sm:$0xf] %vm1096_vm2, %v1070_v18  ;;  %v1039_v24 = vpack.c.bf16 %v975_v19, %v975_v19  ;;  %v336_v25 = vpop.f32.mrf.mxu2 }
  0xca   :  { %v1265_v28 = vpack.c.bf16 %v711_v23, %v710_v22  ;;  %v611_v29 = vmul.f32 %v1676_v62, %v336_v25  ;;  %v505_v30 = vpop.f32.mrf.mxu3 }
  0xcb   :  { %1104 = vst.msk [vmem:[%s2341_s7 + $0x1c] sm:$0xf] %vm1096_vm2, %v1039_v24  ;;  %v939_v32 = vmul.f32 %v1666_v57, %v505_v30  ;;  %v259_v33 = vpop.f32.mrf.mxu0 }
  0xcc   :  { %1409 = vst [vmem:[#allocation2 + $0x18] sm:$0xff] %v1265_v28   ;;  %v679_v34 = vadd.f32 %v1688_v3, %v611_v29  ;;  %v428_v35 = vpop.f32.mrf.mxu1  ;;  %v580_v43 = vmul.f32 %v1676_v62, %v259_v33 }
  0xcd   :  { %v1007_v36 = vadd.f32 %v1671_v61, %v939_v32  ;;  %v908_v37 = vmul.f32 %v1666_v57, %v428_v35 }
  0xce   :  { %v743_v39 = vmax.f32 %v679_v34, 0.0  ;;  %1195 = vmatmul.msk.bf16.gmra.mxu0 %vm128_vm1, %v103_v26  ;;  %1211 = vmatmul.msk.bf16.gmra.mxu2 %vm128_vm1, %v119_v31  ;;  %v648_v49 = vadd.f32 %v1688_v3, %v580_v43 }
  0xcf   :  { %v1071_v40 = vpack.c.bf16 %v1007_v36, %v1007_v36  ;;  %v976_v41 = vadd.f32 %v1671_v61, %v908_v37  ;;  %1243 = vmatmul.msk.bf16.gmra.mxu3 %vm128_vm1, %v119_v31  ;;  %1227 = vmatmul.msk.bf16.gmra.mxu1 %vm128_vm1, %v103_v26  ;;  %v55_v36 = vld [vmem:[%s2334_s0 + $0xe0] sm:$0xff]  ;;  %v56_v37 = vld [vmem:[%s2334_s0 + $0xe8] sm:$0xff] }
  0xd0   :  { %v1345_v42 = vpack.c.bf16 %v743_v39, %v742_v38  ;;  %v712_v1 = vmax.f32 %v648_v49, 0.0 }
  0xd1   :  { %1136 = vst.msk [vmem:[%s2341_s7 + $0x9c] sm:$0xf] %vm1096_vm2, %v1071_v40  ;;  %v1040_v44 = vpack.c.bf16 %v976_v41, %v976_v41  ;;  %v339_v45 = vpop.f32.mrf.mxu2  ;;  %v87_v40 = vld [vmem:[%s2334_s0 + $0x1e0] sm:$0xff]  ;;  %v88_v41 = vld [vmem:[%s2334_s0 + $0x1e8] sm:$0xff] }
  0xd2   :  { %1425 = vst [vmem:[#allocation2 + $0x98] sm:$0xff] %v1345_v42   ;;  %v508_v46 = vpop.f32.mrf.mxu3  ;;  %v612_v54 = vmul.f32 %v1676_v62, %v339_v45 }
  0xd3   :  { %1105 = vst.msk [vmem:[%s2341_s7 + $0x20] sm:$0xf] %vm1096_vm2, %v1040_v44  ;;  %v940_v47 = vmul.f32 %v1666_v57, %v508_v46  ;;  %v261_v48 = vpop.f32.mrf.mxu0  ;;  %v105_v46 = vpack.c.bf16 %v56_v37, %v55_v36 }
  0xd4   :  { %v581_v50 = vmul.f32 %v1676_v62, %v261_v48  ;;  %v430_v51 = vpop.f32.mrf.mxu1  ;;  %v680_v7 = vadd.f32 %v1688_v3, %v612_v54 }
  0xd5   :  { %v1008_v52 = vadd.f32 %v1671_v61, %v940_v47  ;;  %v909_v53 = vmul.f32 %v1666_v57, %v430_v51  ;;  %v121_v51 = vpack.c.bf16 %v88_v41, %v87_v40 }
  0xd6   :  { %v649_v55 = vadd.f32 %v1688_v3, %v581_v50  ;;  %v744_v18 = vmax.f32 %v680_v7, 0.0 }
  0xd7   :  { %v1072_v59 = vpack.c.bf16 %v1008_v52, %v1008_v52  ;;  %v977_v60 = vadd.f32 %v1671_v61, %v909_v53 }
  0xd8   :  { %v713_v2 = vmax.f32 %v649_v55, 0.0 }
  0xd9   :  { %1137 = vst.msk [vmem:[%s2341_s7 + $0xa0] sm:$0xf] %vm1096_vm2, %v1072_v59  ;;  %v1041_v4 = vpack.c.bf16 %v977_v60, %v977_v60  ;;  %v341_v5 = vpop.f32.mrf.mxu2 }
  0xda   :  { %v1270_v8 = vpack.c.bf16 %v713_v2, %v712_v1  ;;  %v613_v9 = vmul.f32 %v1676_v62, %v341_v5  ;;  %v510_v10 = vpop.f32.mrf.mxu3 }
  0xdb   :  { %1106 = vst.msk [vmem:[%s2341_s7 + $0x24] sm:$0xf] %vm1096_vm2, %v1041_v4  ;;  %v941_v12 = vmul.f32 %v1666_v57, %v510_v10  ;;  %v264_v13 = vpop.f32.mrf.mxu0 }
  0xdc   :  { %1410 = vst [vmem:[#allocation2 + $0x20] sm:$0xff] %v1270_v8   ;;  %v681_v14 = vadd.f32 %v1688_v3, %v613_v9  ;;  %v433_v15 = vpop.f32.mrf.mxu1  ;;  %v582_v23 = vmul.f32 %v1676_v62, %v264_v13 }
  0xdd   :  { %v1009_v16 = vadd.f32 %v1671_v61, %v941_v12  ;;  %v910_v17 = vmul.f32 %v1666_v57, %v433_v15 }
  0xde   :  { %v745_v19 = vmax.f32 %v681_v14, 0.0  ;;  %1196 = vmatmul.msk.bf16.gmra.mxu0 %vm128_vm1, %v104_v6  ;;  %1212 = vmatmul.msk.bf16.gmra.mxu2 %vm128_vm1, %v120_v11  ;;  %v650_v29 = vadd.f32 %v1688_v3, %v582_v23 }
  0xdf   :  { %v1073_v20 = vpack.c.bf16 %v1009_v16, %v1009_v16  ;;  %v978_v21 = vadd.f32 %v1671_v61, %v910_v17  ;;  %1244 = vmatmul.msk.bf16.gmra.mxu3 %vm128_vm1, %v120_v11  ;;  %1228 = vmatmul.msk.bf16.gmra.mxu1 %vm128_vm1, %v104_v6  ;;  %v57_v16 = vld [vmem:[%s2334_s0 + $0xf0] sm:$0xff]  ;;  %v58_v17 = vld [vmem:[%s2334_s0 + $0xf8] sm:$0xff] }
  0xe0   :  { %v1350_v22 = vpack.c.bf16 %v745_v19, %v744_v18  ;;  %v714_v42 = vmax.f32 %v650_v29, 0.0 }
  0xe1   :  { %1138 = vst.msk [vmem:[%s2341_s7 + $0xa4] sm:$0xf] %vm1096_vm2, %v1073_v20  ;;  %v1042_v24 = vpack.c.bf16 %v978_v21, %v978_v21  ;;  %v344_v25 = vpop.f32.mrf.mxu2  ;;  %v89_v20 = vld [vmem:[%s2334_s0 + $0x1f0] sm:$0xff]  ;;  %v90_v21 = vld [vmem:[%s2334_s0 + $0x1f8] sm:$0xff] }
  0xe2   :  { %1426 = vst [vmem:[#allocation2 + $0xa0] sm:$0xff] %v1350_v22   ;;  %v513_v26 = vpop.f32.mrf.mxu3  ;;  %v614_v34 = vmul.f32 %v1676_v62, %v344_v25 }
  0xe3   :  { %1107 = vst.msk [vmem:[%s2341_s7 + $0x28] sm:$0xf] %vm1096_vm2, %v1042_v24  ;;  %v942_v27 = vmul.f32 %v1666_v57, %v513_v26  ;;  %v266_v28 = vpop.f32.mrf.mxu0  ;;  %v106_v26 = vpack.c.bf16 %v58_v17, %v57_v16 }
  0xe4   :  { %v583_v30 = vmul.f32 %v1676_v62, %v266_v28  ;;  %v435_v31 = vpop.f32.mrf.mxu1  ;;  %v682_v47 = vadd.f32 %v1688_v3, %v614_v34 }
  0xe5   :  { %v1010_v32 = vadd.f32 %v1671_v61, %v942_v27  ;;  %v911_v33 = vmul.f32 %v1666_v57, %v435_v31  ;;  %v122_v31 = vpack.c.bf16 %v90_v21, %v89_v20 }
  0xe6   :  { %v651_v35 = vadd.f32 %v1688_v3, %v583_v30  ;;  %v746_v59 = vmax.f32 %v682_v47, 0.0 }
  0xe7   :  { %v1074_v38 = vpack.c.bf16 %v1010_v32, %v1010_v32  ;;  %v979_v39 = vadd.f32 %v1671_v61, %v911_v33 }
  0xe8   :  { %v715_v43 = vmax.f32 %v651_v35, 0.0 }
  0xe9   :  { %1139 = vst.msk [vmem:[%s2341_s7 + $0xa8] sm:$0xf] %vm1096_vm2, %v1074_v38  ;;  %v1043_v44 = vpack.c.bf16 %v979_v39, %v979_v39  ;;  %v346_v45 = vpop.f32.mrf.mxu2 }
  0xea   :  { %v1275_v48 = vpack.c.bf16 %v715_v43, %v714_v42  ;;  %v615_v49 = vmul.f32 %v1676_v62, %v346_v45  ;;  %v515_v50 = vpop.f32.mrf.mxu3 }
  0xeb   :  { %1108 = vst.msk [vmem:[%s2341_s7 + $0x2c] sm:$0xf] %vm1096_vm2, %v1043_v44  ;;  %v943_v52 = vmul.f32 %v1666_v57, %v515_v50  ;;  %v269_v53 = vpop.f32.mrf.mxu0 }
  0xec   :  { %1411 = vst [vmem:[#allocation2 + $0x28] sm:$0xff] %v1275_v48   ;;  %v683_v54 = vadd.f32 %v1688_v3, %v615_v49  ;;  %v438_v55 = vpop.f32.mrf.mxu1  ;;  %v584_v2 = vmul.f32 %v1676_v62, %v269_v53 }
  0xed   :  { %v1011_v56 = vadd.f32 %v1671_v61, %v943_v52  ;;  %v912_v58 = vmul.f32 %v1666_v57, %v438_v55 }
  0xee   :  { %v747_v60 = vmax.f32 %v683_v54, 0.0  ;;  %1197 = vmatmul.msk.bf16.gmra.mxu0 %vm128_vm1, %v105_v46  ;;  %1213 = vmatmul.msk.bf16.gmra.mxu2 %vm128_vm1, %v121_v51  ;;  %v652_v9 = vadd.f32 %v1688_v3, %v584_v2 }
  0xef   :  { %v1075_v63 = vpack.c.bf16 %v1011_v56, %v1011_v56  ;;  %v980_v0 = vadd.f32 %v1671_v61, %v912_v58  ;;  %1245 = vmatmul.msk.bf16.gmra.mxu3 %vm128_vm1, %v121_v51  ;;  %1229 = vmatmul.msk.bf16.gmra.mxu1 %vm128_vm1, %v105_v46 }
  0xf0   :  { %v1355_v1 = vpack.c.bf16 %v747_v60, %v746_v59  ;;  %v716_v22 = vmax.f32 %v652_v9, 0.0 }
  0xf1   :  { %1140 = vst.msk [vmem:[%s2341_s7 + $0xac] sm:$0xf] %vm1096_vm2, %v1075_v63  ;;  %v1044_v4 = vpack.c.bf16 %v980_v0, %v980_v0  ;;  %v349_v5 = vpop.f32.mrf.mxu2 }
  0xf2   :  { %1427 = vst [vmem:[#allocation2 + $0xa8] sm:$0xff] %v1355_v1   ;;  %v518_v6 = vpop.f32.mrf.mxu3  ;;  %v616_v14 = vmul.f32 %v1676_v62, %v349_v5 }
  0xf3   :  { %1109 = vst.msk [vmem:[%s2341_s7 + $0x30] sm:$0xf] %vm1096_vm2, %v1044_v4  ;;  %v944_v7 = vmul.f32 %v1666_v57, %v518_v6  ;;  %v271_v8 = vpop.f32.mrf.mxu0 }
  0xf4   :  { %v585_v10 = vmul.f32 %v1676_v62, %v271_v8  ;;  %v440_v11 = vpop.f32.mrf.mxu1  ;;  %v684_v27 = vadd.f32 %v1688_v3, %v616_v14 }
  0xf5   :  { %v1012_v12 = vadd.f32 %v1671_v61, %v944_v7  ;;  %v913_v13 = vmul.f32 %v1666_v57, %v440_v11 }
  0xf6   :  { %v653_v15 = vadd.f32 %v1688_v3, %v585_v10  ;;  %v748_v38 = vmax.f32 %v684_v27, 0.0 }
  0xf7   :  { %v1076_v18 = vpack.c.bf16 %v1012_v12, %v1012_v12  ;;  %v981_v19 = vadd.f32 %v1671_v61, %v913_v13 }
  0xf8   :  { %v717_v23 = vmax.f32 %v653_v15, 0.0 }
  0xf9   :  { %1141 = vst.msk [vmem:[%s2341_s7 + $0xb0] sm:$0xf] %vm1096_vm2, %v1076_v18  ;;  %v1045_v24 = vpack.c.bf16 %v981_v19, %v981_v19  ;;  %v351_v25 = vpop.f32.mrf.mxu2 }
  0xfa   :  { %v1280_v28 = vpack.c.bf16 %v717_v23, %v716_v22  ;;  %v617_v29 = vmul.f32 %v1676_v62, %v351_v25  ;;  %v520_v30 = vpop.f32.mrf.mxu3 }
  0xfb   :  { %1110 = vst.msk [vmem:[%s2341_s7 + $0x34] sm:$0xf] %vm1096_vm2, %v1045_v24  ;;  %v945_v32 = vmul.f32 %v1666_v57, %v520_v30  ;;  %v274_v33 = vpop.f32.mrf.mxu0 }
  0xfc   :  { %1412 = vst [vmem:[#allocation2 + $0x30] sm:$0xff] %v1280_v28   ;;  %v685_v34 = vadd.f32 %v1688_v3, %v617_v29  ;;  %v443_v35 = vpop.f32.mrf.mxu1  ;;  %v586_v43 = vmul.f32 %v1676_v62, %v274_v33 }
  0xfd   :  { %v1013_v36 = vadd.f32 %v1671_v61, %v945_v32  ;;  %v914_v37 = vmul.f32 %v1666_v57, %v443_v35 }
  0xfe   :  { %v749_v39 = vmax.f32 %v685_v34, 0.0  ;;  %1198 = vmatmul.msk.bf16.gmra.mxu0 %vm128_vm1, %v106_v26  ;;  %1214 = vmatmul.msk.bf16.gmra.mxu2 %vm128_vm1, %v122_v31  ;;  %v654_v49 = vadd.f32 %v1688_v3, %v586_v43 }
  0xff   :  { %v1077_v40 = vpack.c.bf16 %v1013_v36, %v1013_v36  ;;  %v982_v41 = vadd.f32 %v1671_v61, %v914_v37  ;;  %1246 = vmatmul.msk.bf16.gmra.mxu3 %vm128_vm1, %v122_v31  ;;  %1230 = vmatmul.msk.bf16.gmra.mxu1 %vm128_vm1, %v106_v26 }
 0x100   :  { %v1360_v42 = vpack.c.bf16 %v749_v39, %v748_v38  ;;  %v718_v59 = vmax.f32 %v654_v49, 0.0 }
 0x101   :  { %1142 = vst.msk [vmem:[%s2341_s7 + $0xb4] sm:$0xf] %vm1096_vm2, %v1077_v40  ;;  %v1046_v44 = vpack.c.bf16 %v982_v41, %v982_v41  ;;  %v354_v45 = vpop.f32.mrf.mxu2 }
 0x102   :  { %1428 = vst [vmem:[#allocation2 + $0xb0] sm:$0xff] %v1360_v42   ;;  %v523_v46 = vpop.f32.mrf.mxu3  ;;  %v618_v54 = vmul.f32 %v1676_v62, %v354_v45 }
 0x103   :  { %1111 = vst.msk [vmem:[%s2341_s7 + $0x38] sm:$0xf] %vm1096_vm2, %v1046_v44  ;;  %v946_v47 = vmul.f32 %v1666_v57, %v523_v46  ;;  %v276_v48 = vpop.f32.mrf.mxu0 }
 0x104   :  { %v587_v50 = vmul.f32 %v1676_v62, %v276_v48  ;;  %v445_v51 = vpop.f32.mrf.mxu1  ;;  %v686_v1 = vadd.f32 %v1688_v3, %v618_v54 }
 0x105   :  { %v1014_v52 = vadd.f32 %v1671_v61, %v946_v47  ;;  %v915_v53 = vmul.f32 %v1666_v57, %v445_v51 }
 0x106   :  { %v655_v55 = vadd.f32 %v1688_v3, %v587_v50  ;;  %v750_v12 = vmax.f32 %v686_v1, 0.0 }
 0x107   :  { %v1078_v56 = vpack.c.bf16 %v1014_v52, %v1014_v52  ;;  %v983_v58 = vadd.f32 %v1671_v61, %v915_v53 }
 0x108   :  { %v719_v60 = vmax.f32 %v655_v55, 0.0 }
 0x109   :  { %1143 = vst.msk [vmem:[%s2341_s7 + $0xb8] sm:$0xf] %vm1096_vm2, %v1078_v56  ;;  %v1047_v63 = vpack.c.bf16 %v983_v58, %v983_v58  ;;  %v356_v0 = vpop.f32.mrf.mxu2 }
 0x10a   :  { %v1285_v2 = vpack.c.bf16 %v719_v60, %v718_v59  ;;  %v619_v4 = vmul.f32 %v1676_v62, %v356_v0  ;;  %v525_v5 = vpop.f32.mrf.mxu3 }
 0x10b   :  { %1112 = vst.msk [vmem:[%s2341_s7 + $0x3c] sm:$0xf] %vm1096_vm2, %v1047_v63  ;;  %v947_v6 = vmul.f32 %v1666_v57, %v525_v5  ;;  %v279_v7 = vpop.f32.mrf.mxu0 }
 0x10c   :  { %1413 = vst [vmem:[#allocation2 + $0x38] sm:$0xff] %v1285_v2   ;;  %v687_v8 = vadd.f32 %v1688_v3, %v619_v4  ;;  %v448_v9 = vpop.f32.mrf.mxu1  ;;  %v588_v17 = vmul.f32 %v1676_v62, %v279_v7 }
 0x10d   :  { %v1015_v10 = vadd.f32 %v1671_v61, %v947_v6  ;;  %v916_v11 = vmul.f32 %v1666_v57, %v448_v9 }
 0x10e   :  { %v751_v13 = vmax.f32 %v687_v8, 0.0  ;;  %v656_v23 = vadd.f32 %v1688_v3, %v588_v17 }
 0x10f   :  { %v1079_v14 = vpack.c.bf16 %v1015_v10, %v1015_v10  ;;  %v984_v15 = vadd.f32 %v1671_v61, %v916_v11 }
 0x110   :  { %v1365_v16 = vpack.c.bf16 %v751_v13, %v750_v12  ;;  %v720_v32 = vmax.f32 %v656_v23, 0.0 }
 0x111   :  { %1144 = vst.msk [vmem:[%s2341_s7 + $0xbc] sm:$0xf] %vm1096_vm2, %v1079_v14  ;;  %v1048_v18 = vpack.c.bf16 %v984_v15, %v984_v15  ;;  %v359_v19 = vpop.f32.mrf.mxu2 }
 0x112   :  { %1429 = vst [vmem:[#allocation2 + $0xb8] sm:$0xff] %v1365_v16   ;;  %v528_v20 = vpop.f32.mrf.mxu3  ;;  %v620_v28 = vmul.f32 %v1676_v62, %v359_v19 }
 0x113   :  { %1113 = vst.msk [vmem:[%s2341_s7 + $0x40] sm:$0xf] %vm1096_vm2, %v1048_v18  ;;  %v948_v21 = vmul.f32 %v1666_v57, %v528_v20  ;;  %v281_v22 = vpop.f32.mrf.mxu0 }
 0x114   :  { %v589_v24 = vmul.f32 %v1676_v62, %v281_v22  ;;  %v450_v25 = vpop.f32.mrf.mxu1  ;;  %v688_v36 = vadd.f32 %v1688_v3, %v620_v28 }
 0x115   :  { %v1016_v26 = vadd.f32 %v1671_v61, %v948_v21  ;;  %v917_v27 = vmul.f32 %v1666_v57, %v450_v25 }
 0x116   :  { %v657_v29 = vadd.f32 %v1688_v3, %v589_v24  ;;  %v752_v46 = vmax.f32 %v688_v36, 0.0 }
 0x117   :  { %v1080_v30 = vpack.c.bf16 %v1016_v26, %v1016_v26  ;;  %v985_v31 = vadd.f32 %v1671_v61, %v917_v27 }
 0x118   :  { %v721_v33 = vmax.f32 %v657_v29, 0.0 }
 0x119   :  { %1145 = vst.msk [vmem:[%s2341_s7 + $0xc0] sm:$0xf] %vm1096_vm2, %v1080_v30  ;;  %v1049_v34 = vpack.c.bf16 %v985_v31, %v985_v31  ;;  %v361_v35 = vpop.f32.mrf.mxu2 }
 0x11a   :  { %v1290_v37 = vpack.c.bf16 %v721_v33, %v720_v32  ;;  %v621_v38 = vmul.f32 %v1676_v62, %v361_v35  ;;  %v530_v39 = vpop.f32.mrf.mxu3 }
 0x11b   :  { %1114 = vst.msk [vmem:[%s2341_s7 + $0x44] sm:$0xf] %vm1096_vm2, %v1049_v34  ;;  %v949_v40 = vmul.f32 %v1666_v57, %v530_v39  ;;  %v284_v41 = vpop.f32.mrf.mxu0 }
 0x11c   :  { %1414 = vst [vmem:[#allocation2 + $0x40] sm:$0xff] %v1290_v37   ;;  %v689_v42 = vadd.f32 %v1688_v3, %v621_v38  ;;  %v453_v43 = vpop.f32.mrf.mxu1  ;;  %v590_v51 = vmul.f32 %v1676_v62, %v284_v41 }
 0x11d   :  { %v1017_v44 = vadd.f32 %v1671_v61, %v949_v40  ;;  %v918_v45 = vmul.f32 %v1666_v57, %v453_v43 }
 0x11e   :  { %v753_v47 = vmax.f32 %v689_v42, 0.0  ;;  %v658_v58 = vadd.f32 %v1688_v3, %v590_v51  ;;  %v2149_v51 = vld [vmem:[%s2339_s5] ss:$0 sm:$0xff] }
 0x11f   :  { %v1081_v48 = vpack.c.bf16 %v1017_v44, %v1017_v44  ;;  %v986_v49 = vadd.f32 %v1671_v61, %v918_v45 }
 0x120   :  { %v1370_v50 = vpack.c.bf16 %v753_v47, %v752_v46  ;;  %v722_v6 = vmax.f32 %v658_v58, 0.0  ;;  %v2162_v58 = vld [vmem:[%s2336_s2] ss:$0 sm:$0xff] }
 0x121   :  { %1146 = vst.msk [vmem:[%s2341_s7 + $0xc4] sm:$0xf] %vm1096_vm2, %v1081_v48  ;;  %v1050_v52 = vpack.c.bf16 %v986_v49, %v986_v49  ;;  %v364_v53 = vpop.f32.mrf.mxu2 }
 0x122   :  { %1430 = vst [vmem:[#allocation2 + $0xc0] sm:$0xff] %v1370_v50   ;;  %v533_v54 = vpop.f32.mrf.mxu3  ;;  %v622_v1 = vmul.f32 %v1676_v62, %v364_v53 }
 0x123   :  { %1115 = vst.msk [vmem:[%s2341_s7 + $0x48] sm:$0xf] %vm1096_vm2, %v1050_v52  ;;  %v950_v55 = vmul.f32 %v1666_v57, %v533_v54  ;;  %v286_v56 = vpop.f32.mrf.mxu0  ;;  %v2155_v52 = vld [vmem:[%s2338_s4] ss:$0 sm:$0xff] }
 0x124   :  { %v591_v59 = vmul.f32 %v1676_v62, %v286_v56  ;;  %v455_v60 = vpop.f32.mrf.mxu1  ;;  %v690_v10 = vadd.f32 %v1688_v3, %v622_v1 }
 0x125   :  { %v1018_v63 = vadd.f32 %v1671_v61, %v950_v55  ;;  %v919_v0 = vmul.f32 %v1666_v57, %v455_v60 }
 0x126   :  { %v659_v2 = vadd.f32 %v1688_v3, %v591_v59  ;;  %v754_v20 = vmax.f32 %v690_v10, 0.0 }
 0x127   :  { %v1082_v4 = vpack.c.bf16 %v1018_v63, %v1018_v63  ;;  %v987_v5 = vadd.f32 %v1671_v61, %v919_v0 }
 0x128   :  { %v723_v7 = vmax.f32 %v659_v2, 0.0 }
 0x129   :  { %1147 = vst.msk [vmem:[%s2341_s7 + $0xc8] sm:$0xf] %vm1096_vm2, %v1082_v4  ;;  %v1051_v8 = vpack.c.bf16 %v987_v5, %v987_v5  ;;  %v366_v9 = vpop.f32.mrf.mxu2  ;;  %v2177_v4 = vld [vmem:[%s2337_s3] ss:$0 sm:$0xff] }
 0x12a   :  { %v1295_v11 = vpack.c.bf16 %v723_v7, %v722_v6  ;;  %v623_v12 = vmul.f32 %v1676_v62, %v366_v9  ;;  %v535_v13 = vpop.f32.mrf.mxu3 }
 0x12b   :  { %1116 = vst.msk [vmem:[%s2341_s7 + $0x4c] sm:$0xf] %vm1096_vm2, %v1051_v8  ;;  %v951_v14 = vmul.f32 %v1666_v57, %v535_v13  ;;  %v289_v15 = vpop.f32.mrf.mxu0 }
 0x12c   :  { %1415 = vst [vmem:[#allocation2 + $0x48] sm:$0xff] %v1295_v11   ;;  %v691_v16 = vadd.f32 %v1688_v3, %v623_v12  ;;  %v458_v17 = vpop.f32.mrf.mxu1  ;;  %v592_v25 = vmul.f32 %v1676_v62, %v289_v15 }
 0x12d   :  { %v1019_v18 = vadd.f32 %v1671_v61, %v951_v14  ;;  %v920_v19 = vmul.f32 %v1666_v57, %v458_v17 }
 0x12e   :  { %v755_v21 = vmax.f32 %v691_v16, 0.0  ;;  %v660_v31 = vadd.f32 %v1688_v3, %v592_v25 }
 0x12f   :  { %v1083_v22 = vpack.c.bf16 %v1019_v18, %v1019_v18  ;;  %v988_v23 = vadd.f32 %v1671_v61, %v920_v19 }
 0x130   :  { %v1375_v24 = vpack.c.bf16 %v755_v21, %v754_v20  ;;  %v724_v40 = vmax.f32 %v660_v31, 0.0 }
 0x131   :  { %1148 = vst.msk [vmem:[%s2341_s7 + $0xcc] sm:$0xf] %vm1096_vm2, %v1083_v22  ;;  %v1052_v26 = vpack.c.bf16 %v988_v23, %v988_v23  ;;  %v369_v27 = vpop.f32.mrf.mxu2 }
 0x132   :  { %1431 = vst [vmem:[#allocation2 + $0xc8] sm:$0xff] %v1375_v24   ;;  %v538_v28 = vpop.f32.mrf.mxu3  ;;  %v624_v36 = vmul.f32 %v1676_v62, %v369_v27 }
 0x133   :  { %1117 = vst.msk [vmem:[%s2341_s7 + $0x50] sm:$0xf] %vm1096_vm2, %v1052_v26  ;;  %v952_v29 = vmul.f32 %v1666_v57, %v538_v28  ;;  %v291_v30 = vpop.f32.mrf.mxu0 }
 0x134   :  { %v593_v32 = vmul.f32 %v1676_v62, %v291_v30  ;;  %v460_v33 = vpop.f32.mrf.mxu1  ;;  %v692_v44 = vadd.f32 %v1688_v3, %v624_v36 }
 0x135   :  { %v1020_v34 = vadd.f32 %v1671_v61, %v952_v29  ;;  %v921_v35 = vmul.f32 %v1666_v57, %v460_v33 }
 0x136   :  { %v661_v37 = vadd.f32 %v1688_v3, %v593_v32 }
 0x137   :  { %v1084_v38 = vpack.c.bf16 %v1020_v34, %v1020_v34  ;;  %v989_v39 = vadd.f32 %v1671_v61, %v921_v35 }
 0x138   :  { %v725_v41 = vmax.f32 %v661_v37, 0.0 }
 0x139   :  { %1149 = vst.msk [vmem:[%s2341_s7 + $0xd0] sm:$0xf] %vm1096_vm2, %v1084_v38  ;;  %v1053_v42 = vpack.c.bf16 %v989_v39, %v989_v39  ;;  %v371_v43 = vpop.f32.mrf.mxu2 }
 0x13a   :  { %v1300_v45 = vpack.c.bf16 %v725_v41, %v724_v40  ;;  %v625_v46 = vmul.f32 %v1676_v62, %v371_v43  ;;  %v540_v47 = vpop.f32.mrf.mxu3 }
 0x13b   :  { %1118 = vst.msk [vmem:[%s2341_s7 + $0x54] sm:$0xf] %vm1096_vm2, %v1053_v42  ;;  %v953_v61 = vmul.f32 %v1666_v57, %v540_v47  ;;  %v294_v48 = vpop.f32.mrf.mxu0  ;;  %v756_v57 = vmax.f32 %v692_v44, 0.0 }
 0x13c   :  { %1416 = vst [vmem:[#allocation2 + $0x50] sm:$0xff] %v1300_v45   ;;  %v693_v49 = vadd.f32 %v1688_v3, %v625_v46  ;;  %v463_v50 = vpop.f32.mrf.mxu1  ;;  %v594_v59 = vmul.f32 %v2162_v58, %v294_v48 }
 0x13d   :  { %v1021_v62 = vadd.f32 %v2149_v51, %v953_v61  ;;  %v922_v53 = vmul.f32 %v2155_v52, %v463_v50 }
 0x13e   :  { %v757_v54 = vmax.f32 %v693_v49, 0.0  ;;  %v662_v5 = vadd.f32 %v2177_v4, %v594_v59 }
 0x13f   :  { %v1085_v55 = vpack.c.bf16 %v1021_v62, %v1021_v62  ;;  %v990_v3 = vadd.f32 %v2149_v51, %v922_v53 }
 0x140   :  { %v1380_v56 = vpack.c.bf16 %v757_v54, %v756_v57  ;;  %v726_v14 = vmax.f32 %v662_v5, 0.0 }
 0x141   :  { %1150 = vst.msk [vmem:[%s2341_s7 + $0xd4] sm:$0xf] %vm1096_vm2, %v1085_v55  ;;  %v1054_v60 = vpack.c.bf16 %v990_v3, %v990_v3  ;;  %v374_v63 = vpop.f32.mrf.mxu2 }
 0x142   :  { %1432 = vst [vmem:[#allocation2 + $0xd0] sm:$0xff] %v1380_v56   ;;  %v543_v0 = vpop.f32.mrf.mxu3  ;;  %v626_v10 = vmul.f32 %v2162_v58, %v374_v63 }
 0x143   :  { %1119 = vst.msk [vmem:[%s2341_s7 + $0x58] sm:$0xf] %vm1096_vm2, %v1054_v60  ;;  %v954_v1 = vmul.f32 %v2155_v52, %v543_v0  ;;  %v296_v2 = vpop.f32.mrf.mxu0 }
 0x144   :  { %v595_v6 = vmul.f32 %v2162_v58, %v296_v2  ;;  %v465_v7 = vpop.f32.mrf.mxu1  ;;  %v694_v18 = vadd.f32 %v2177_v4, %v626_v10 }
 0x145   :  { %v1022_v8 = vadd.f32 %v2149_v51, %v954_v1  ;;  %v923_v9 = vmul.f32 %v2155_v52, %v465_v7 }
 0x146   :  { %v663_v11 = vadd.f32 %v2177_v4, %v595_v6  ;;  %v758_v28 = vmax.f32 %v694_v18, 0.0 }
 0x147   :  { %v1086_v12 = vpack.c.bf16 %v1022_v8, %v1022_v8  ;;  %v991_v13 = vadd.f32 %v2149_v51, %v923_v9 }
 0x148   :  { %v727_v15 = vmax.f32 %v663_v11, 0.0 }
 0x149   :  { %1151 = vst.msk [vmem:[%s2341_s7 + $0xd8] sm:$0xf] %vm1096_vm2, %v1086_v12  ;;  %v1055_v16 = vpack.c.bf16 %v991_v13, %v991_v13  ;;  %v376_v17 = vpop.f32.mrf.mxu2 }
 0x14a   :  { %v1305_v19 = vpack.c.bf16 %v727_v15, %v726_v14  ;;  %v627_v20 = vmul.f32 %v2162_v58, %v376_v17  ;;  %v545_v21 = vpop.f32.mrf.mxu3 }
 0x14b   :  { %1120 = vst.msk [vmem:[%s2341_s7 + $0x5c] sm:$0xf] %vm1096_vm2, %v1055_v16  ;;  %v955_v22 = vmul.f32 %v2155_v52, %v545_v21  ;;  %v299_v23 = vpop.f32.mrf.mxu0 }
 0x14c   :  { %1417 = vst [vmem:[#allocation2 + $0x58] sm:$0xff] %v1305_v19   ;;  %v695_v24 = vadd.f32 %v2177_v4, %v627_v20  ;;  %v468_v25 = vpop.f32.mrf.mxu1  ;;  %v596_v33 = vmul.f32 %v2162_v58, %v299_v23 }
 0x14d   :  { %v1023_v26 = vadd.f32 %v2149_v51, %v955_v22  ;;  %v924_v27 = vmul.f32 %v2155_v52, %v468_v25 }
 0x14e   :  { %v759_v29 = vmax.f32 %v695_v24, 0.0  ;;  %v664_v39 = vadd.f32 %v2177_v4, %v596_v33 }
 0x14f   :  { %v1087_v30 = vpack.c.bf16 %v1023_v26, %v1023_v26  ;;  %v992_v31 = vadd.f32 %v2149_v51, %v924_v27 }
 0x150   :  { %v1385_v32 = vpack.c.bf16 %v759_v29, %v758_v28  ;;  %v728_v61 = vmax.f32 %v664_v39, 0.0 }
 0x151   :  { %1152 = vst.msk [vmem:[%s2341_s7 + $0xdc] sm:$0xf] %vm1096_vm2, %v1087_v30  ;;  %v1056_v34 = vpack.c.bf16 %v992_v31, %v992_v31  ;;  %v379_v35 = vpop.f32.mrf.mxu2 }
 0x152   :  { %1433 = vst [vmem:[#allocation2 + $0xd8] sm:$0xff] %v1385_v32   ;;  %v548_v36 = vpop.f32.mrf.mxu3  ;;  %v628_v44 = vmul.f32 %v2162_v58, %v379_v35 }
 0x153   :  { %1121 = vst.msk [vmem:[%s2341_s7 + $0x60] sm:$0xf] %vm1096_vm2, %v1056_v34  ;;  %v956_v37 = vmul.f32 %v2155_v52, %v548_v36  ;;  %v301_v38 = vpop.f32.mrf.mxu0 }
 0x154   :  { %v597_v40 = vmul.f32 %v2162_v58, %v301_v38  ;;  %v470_v41 = vpop.f32.mrf.mxu1  ;;  %v696_v62 = vadd.f32 %v2177_v4, %v628_v44 }
 0x155   :  { %v1024_v42 = vadd.f32 %v2149_v51, %v956_v37  ;;  %v925_v43 = vmul.f32 %v2155_v52, %v470_v41 }
 0x156   :  { %v665_v45 = vadd.f32 %v2177_v4, %v597_v40  ;;  %v760_v0 = vmax.f32 %v696_v62, 0.0 }
 0x157   :  { %v1088_v46 = vpack.c.bf16 %v1024_v42, %v1024_v42  ;;  %v993_v47 = vadd.f32 %v2149_v51, %v925_v43 }
 0x158   :  { %v729_v48 = vmax.f32 %v665_v45, 0.0 }
 0x159   :  { %1153 = vst.msk [vmem:[%s2341_s7 + $0xe0] sm:$0xf] %vm1096_vm2, %v1088_v46  ;;  %v1057_v49 = vpack.c.bf16 %v993_v47, %v993_v47  ;;  %v381_v50 = vpop.f32.mrf.mxu2 }
 0x15a   :  { %v1310_v53 = vpack.c.bf16 %v729_v48, %v728_v61  ;;  %v629_v57 = vmul.f32 %v2162_v58, %v381_v50  ;;  %v550_v54 = vpop.f32.mrf.mxu3 }
 0x15b   :  { %1122 = vst.msk [vmem:[%s2341_s7 + $0x64] sm:$0xf] %vm1096_vm2, %v1057_v49  ;;  %v957_v55 = vmul.f32 %v2155_v52, %v550_v54  ;;  %v304_v3 = vpop.f32.mrf.mxu0 }
 0x15c   :  { %1418 = vst [vmem:[#allocation2 + $0x60] sm:$0xff] %v1310_v53   ;;  %v697_v56 = vadd.f32 %v2177_v4, %v629_v57  ;;  %v473_v59 = vpop.f32.mrf.mxu1  ;;  %v598_v7 = vmul.f32 %v2162_v58, %v304_v3 }
 0x15d   :  { %v1025_v60 = vadd.f32 %v2149_v51, %v957_v55  ;;  %v926_v63 = vmul.f32 %v2155_v52, %v473_v59 }
 0x15e   :  { %v761_v1 = vmax.f32 %v697_v56, 0.0  ;;  %v666_v13 = vadd.f32 %v2177_v4, %v598_v7 }
 0x15f   :  { %v1089_v2 = vpack.c.bf16 %v1025_v60, %v1025_v60  ;;  %v994_v5 = vadd.f32 %v2149_v51, %v926_v63 }
 0x160   :  { %v1390_v6 = vpack.c.bf16 %v761_v1, %v760_v0  ;;  %v730_v22 = vmax.f32 %v666_v13, 0.0 }
 0x161   :  { %1154 = vst.msk [vmem:[%s2341_s7 + $0xe4] sm:$0xf] %vm1096_vm2, %v1089_v2  ;;  %v1058_v8 = vpack.c.bf16 %v994_v5, %v994_v5  ;;  %v384_v9 = vpop.f32.mrf.mxu2 }
 0x162   :  { %1434 = vst [vmem:[#allocation2 + $0xe0] sm:$0xff] %v1390_v6   ;;  %v553_v10 = vpop.f32.mrf.mxu3  ;;  %v630_v18 = vmul.f32 %v2162_v58, %v384_v9 }
 0x163   :  { %1123 = vst.msk [vmem:[%s2341_s7 + $0x68] sm:$0xf] %vm1096_vm2, %v1058_v8  ;;  %v958_v11 = vmul.f32 %v2155_v52, %v553_v10  ;;  %v306_v12 = vpop.f32.mrf.mxu0 }
 0x164   :  { %v599_v14 = vmul.f32 %v2162_v58, %v306_v12  ;;  %v475_v15 = vpop.f32.mrf.mxu1  ;;  %v698_v26 = vadd.f32 %v2177_v4, %v630_v18 }
 0x165   :  { %v1026_v16 = vadd.f32 %v2149_v51, %v958_v11  ;;  %v927_v17 = vmul.f32 %v2155_v52, %v475_v15 }
 0x166   :  { %v667_v19 = vadd.f32 %v2177_v4, %v599_v14  ;;  %v762_v36 = vmax.f32 %v698_v26, 0.0 }
 0x167   :  { %v1090_v20 = vpack.c.bf16 %v1026_v16, %v1026_v16  ;;  %v995_v21 = vadd.f32 %v2149_v51, %v927_v17 }
 0x168   :  { %v731_v23 = vmax.f32 %v667_v19, 0.0 }
 0x169   :  { %1155 = vst.msk [vmem:[%s2341_s7 + $0xe8] sm:$0xf] %vm1096_vm2, %v1090_v20  ;;  %v1059_v24 = vpack.c.bf16 %v995_v21, %v995_v21  ;;  %v386_v25 = vpop.f32.mrf.mxu2 }
 0x16a   :  { %v1315_v27 = vpack.c.bf16 %v731_v23, %v730_v22  ;;  %v631_v28 = vmul.f32 %v2162_v58, %v386_v25  ;;  %v555_v29 = vpop.f32.mrf.mxu3 }
 0x16b   :  { %1124 = vst.msk [vmem:[%s2341_s7 + $0x6c] sm:$0xf] %vm1096_vm2, %v1059_v24  ;;  %v959_v30 = vmul.f32 %v2155_v52, %v555_v29  ;;  %v309_v31 = vpop.f32.mrf.mxu0 }
 0x16c   :  { %1419 = vst [vmem:[#allocation2 + $0x68] sm:$0xff] %v1315_v27   ;;  %v699_v32 = vadd.f32 %v2177_v4, %v631_v28  ;;  %v478_v33 = vpop.f32.mrf.mxu1  ;;  %v600_v41 = vmul.f32 %v2162_v58, %v309_v31 }
 0x16d   :  { %v1027_v34 = vadd.f32 %v2149_v51, %v959_v30  ;;  %v928_v35 = vmul.f32 %v2155_v52, %v478_v33 }
 0x16e   :  { %v763_v37 = vmax.f32 %v699_v32, 0.0  ;;  %v668_v47 = vadd.f32 %v2177_v4, %v600_v41 }
 0x16f   :  { %v1091_v38 = vpack.c.bf16 %v1027_v34, %v1027_v34  ;;  %v996_v39 = vadd.f32 %v2149_v51, %v928_v35 }
 0x170   :  { %v1395_v40 = vpack.c.bf16 %v763_v37, %v762_v36  ;;  %v732_v55 = vmax.f32 %v668_v47, 0.0 }
 0x171   :  { %1156 = vst.msk [vmem:[%s2341_s7 + $0xec] sm:$0xf] %vm1096_vm2, %v1091_v38  ;;  %v1060_v42 = vpack.c.bf16 %v996_v39, %v996_v39  ;;  %v389_v43 = vpop.f32.mrf.mxu2 }
 0x172   :  { %1435 = vst [vmem:[#allocation2 + $0xe8] sm:$0xff] %v1395_v40   ;;  %v558_v44 = vpop.f32.mrf.mxu3  ;;  %v632_v62 = vmul.f32 %v2162_v58, %v389_v43 }
 0x173   :  { %1125 = vst.msk [vmem:[%s2341_s7 + $0x70] sm:$0xf] %vm1096_vm2, %v1060_v42  ;;  %v960_v45 = vmul.f32 %v2155_v52, %v558_v44  ;;  %v311_v46 = vpop.f32.mrf.mxu0 }
 0x174   :  { %v601_v61 = vmul.f32 %v2162_v58, %v311_v46  ;;  %v480_v48 = vpop.f32.mrf.mxu1  ;;  %v700_v60 = vadd.f32 %v2177_v4, %v632_v62 }
 0x175   :  { %v1028_v49 = vadd.f32 %v2149_v51, %v960_v45  ;;  %v929_v50 = vmul.f32 %v2155_v52, %v480_v48 }
 0x176   :  { %v669_v53 = vadd.f32 %v2177_v4, %v601_v61  ;;  %v764_v10 = vmax.f32 %v700_v60, 0.0 }
 0x177   :  { %v1092_v57 = vpack.c.bf16 %v1028_v49, %v1028_v49  ;;  %v997_v54 = vadd.f32 %v2149_v51, %v929_v50 }
 0x178   :  { %v733_v3 = vmax.f32 %v669_v53, 0.0 }
 0x179   :  { %1157 = vst.msk [vmem:[%s2341_s7 + $0xf0] sm:$0xf] %vm1096_vm2, %v1092_v57  ;;  %v1061_v56 = vpack.c.bf16 %v997_v54, %v997_v54  ;;  %v391_v59 = vpop.f32.mrf.mxu2 }
 0x17a   :  { %v1320_v63 = vpack.c.bf16 %v733_v3, %v732_v55  ;;  %v633_v0 = vmul.f32 %v2162_v58, %v391_v59  ;;  %v560_v1 = vpop.f32.mrf.mxu3 }
 0x17b   :  { %1126 = vst.msk [vmem:[%s2341_s7 + $0x74] sm:$0xf] %vm1096_vm2, %v1061_v56  ;;  %v961_v2 = vmul.f32 %v2155_v52, %v560_v1  ;;  %v314_v5 = vpop.f32.mrf.mxu0 }
 0x17c   :  { %1420 = vst [vmem:[#allocation2 + $0x70] sm:$0xff] %v1320_v63   ;;  %v701_v6 = vadd.f32 %v2177_v4, %v633_v0  ;;  %v483_v7 = vpop.f32.mrf.mxu1  ;;  %v602_v15 = vmul.f32 %v2162_v58, %v314_v5 }
 0x17d   :  { %v1029_v8 = vadd.f32 %v2149_v51, %v961_v2  ;;  %v930_v9 = vmul.f32 %v2155_v52, %v483_v7 }
 0x17e   :  { %v765_v11 = vmax.f32 %v701_v6, 0.0  ;;  %v670_v21 = vadd.f32 %v2177_v4, %v602_v15 }
 0x17f   :  { %v1093_v12 = vpack.c.bf16 %v1029_v8, %v1029_v8  ;;  %v998_v13 = vadd.f32 %v2149_v51, %v930_v9 }
 0x180   :  { %v1400_v14 = vpack.c.bf16 %v765_v11, %v764_v10  ;;  %v734_v30 = vmax.f32 %v670_v21, 0.0 }
 0x181   :  { %1158 = vst.msk [vmem:[%s2341_s7 + $0xf4] sm:$0xf] %vm1096_vm2, %v1093_v12  ;;  %v1062_v16 = vpack.c.bf16 %v998_v13, %v998_v13  ;;  %v394_v17 = vpop.f32.mrf.mxu2 }
 0x182   :  { %1436 = vst [vmem:[#allocation2 + $0xf0] sm:$0xff] %v1400_v14   ;;  %v563_v18 = vpop.f32.mrf.mxu3  ;;  %v634_v26 = vmul.f32 %v2162_v58, %v394_v17 }
 0x183   :  { %1127 = vst.msk [vmem:[%s2341_s7 + $0x78] sm:$0xf] %vm1096_vm2, %v1062_v16  ;;  %v962_v19 = vmul.f32 %v2155_v52, %v563_v18  ;;  %v316_v20 = vpop.f32.mrf.mxu0 }
 0x184   :  { %v603_v22 = vmul.f32 %v2162_v58, %v316_v20  ;;  %v485_v23 = vpop.f32.mrf.mxu1  ;;  %v702_v34 = vadd.f32 %v2177_v4, %v634_v26 }
 0x185   :  { %v1030_v24 = vadd.f32 %v2149_v51, %v962_v19  ;;  %v931_v25 = vmul.f32 %v2155_v52, %v485_v23 }
 0x186   :  { %v671_v27 = vadd.f32 %v2177_v4, %v603_v22 }
 0x187   :  { %v1094_v28 = vpack.c.bf16 %v1030_v24, %v1030_v24  ;;  %v999_v29 = vadd.f32 %v2149_v51, %v931_v25 }
 0x188   :  { %v735_v31 = vmax.f32 %v671_v27, 0.0 }
 0x189   :  { %1159 = vst.msk [vmem:[%s2341_s7 + $0xf8] sm:$0xf] %vm1096_vm2, %v1094_v28  ;;  %v1063_v32 = vpack.c.bf16 %v999_v29, %v999_v29  ;;  %v396_v33 = vpop.f32.mrf.mxu2 }
 0x18a   :  { %v1325_v35 = vpack.c.bf16 %v735_v31, %v734_v30  ;;  %v635_v36 = vmul.f32 %v2162_v58, %v396_v33  ;;  %v565_v37 = vpop.f32.mrf.mxu3  ;;  %v766_v58 = vmax.f32 %v702_v34, 0.0 }
 0x18b   :  { %1128 = vst.msk [vmem:[%s2341_s7 + $0x7c] sm:$0xf] %vm1096_vm2, %v1063_v32  ;;  %v963_v38 = vmul.f32 %v2155_v52, %v565_v37 }
 0x18c   :  { %1421 = vst [vmem:[#allocation2 + $0x78] sm:$0xff] %v1325_v35   ;;  %v703_v39 = vadd.f32 %v2177_v4, %v635_v36 }
 0x18d   :  { %v1031_v40 = vadd.f32 %v2149_v51, %v963_v38 }
 0x18e   :  { %v767_v41 = vmax.f32 %v703_v39, 0.0 }
 0x18f   :  { %v1095_v42 = vpack.c.bf16 %v1031_v40, %v1031_v40 }
 0x190   :  { %v1405_v43 = vpack.c.bf16 %v767_v41, %v766_v58 }
 0x191   :  { %1160 = vst.msk [vmem:[%s2341_s7 + $0xfc] sm:$0xf] %vm1096_vm2, %v1095_v42 }
 0x192   :  { %1437 = vst [vmem:[#allocation2 + $0xf8] sm:$0xff] %v1405_v43  }
 0x193   :  { %1173 = dma.vmem_to_hbm [thread:$0]  %s1166_s22, 4096, %s1168_s24, [#allocation3], %s1478_s27, %s1478_s27, %s1479_s28  }
 0x194   :  { %1475 = dma.done.wait [#allocation3], 4096  }
 0x195   :  { %1476 = vsyncadd [#allocation3], 4294963200 }
 0x196   :  { %1182 = vsyncpa [#allocation3], 1 }

</bundles_post_ra>
